<compile_context>
chip_gen: v7x
topology: tpu7x:2x2x1
jax: 0.10.0
libtpu: 0.0.40
codegen_flags: <defaults>
</compile_context>

<pallas_src>
import functools

import jax
import jax.numpy as jnp
from jax.experimental import pallas as pl
from jax.experimental.pallas import tpu as pltpu

BN_EPS = 1e-5
C_FC = 256            # channels produced by the fc / consumed by conv block 1
NEG_INF = -1e30       # softmax mask value for padded vocab lanes
ROW_TILE = 16         # bf16 sublane tile -> batch-slab row alignment


# ---------------------------------------------------------------------------
# In-kernel helpers
# ---------------------------------------------------------------------------
def _conv3_matmul(xbuf_ref, w_ref, b_pad, n_pad, c_in):
    """k=3 / padding=1 Conv1d as three shifted-slice MXU matmuls (f32 acc).

    xbuf holds the activation in channel-last rows (row r = l*b_pad + b) with
    one zero halo slab of b_pad rows above and below, so the l-1 / l / l+1 tap
    windows are plain static, sublane-aligned reads at offsets 0 / b_pad /
    2*b_pad.  The taps are contracted separately and accumulated in f32 (MXU
    accumulates; no (N, 3*Cin) concatenated temporary).
    """
    left = xbuf_ref[0:n_pad, 0:c_in]                          # x[b, :, l-1]
    center = xbuf_ref[b_pad:b_pad + n_pad, 0:c_in]            # x[b, :, l]
    right = xbuf_ref[2 * b_pad:2 * b_pad + n_pad, 0:c_in]     # x[b, :, l+1]
    y = jnp.dot(left, w_ref[0], preferred_element_type=jnp.float32)
    y = y + jnp.dot(center, w_ref[1], preferred_element_type=jnp.float32)
    y = y + jnp.dot(right, w_ref[2], preferred_element_type=jnp.float32)
    return y                                                  # (n_pad, Cout) f32


def _bn_relu(y, gamma, beta, inv_n):
    """Train-mode BatchNorm1d (biased stats over the true B*L rows) + ReLU.

    Padded batch rows of `y` are exactly zero, so summing over all rows and
    dividing by the true count gives the correct batch statistics.  The conv
    bias was dropped at prep time (cancelled exactly by the mean subtraction).
    One-pass E[x^2]-E[x]^2 is fine at these magnitudes (var clamped at 0).
    """
    mean = jnp.sum(y, axis=0, keepdims=True) * inv_n
    ex2 = jnp.sum(y * y, axis=0, keepdims=True) * inv_n
    var = jnp.maximum(ex2 - mean * mean, 0.0)
    scale = gamma * jax.lax.rsqrt(var + BN_EPS)               # (1, Cout)
    shift = beta - mean * scale
    return jnp.maximum(y * scale + shift, 0.0)


def generator_kernel(z_ref, fcw_ref,
                     w1_ref, g1_ref, be1_ref,
                     w2_ref, g2_ref, be2_ref,
                     w3_ref, b3_ref,
                     o_ref, xbuf_ref, *, batch):
    b_pad = z_ref.shape[0]              # batch padded to the bf16 sublane tile
    seq = fcw_ref.shape[0]              # L
    n_pad = seq * b_pad                 # rows r = l*b_pad + b
    c0 = xbuf_ref.shape[1]              # 256
    act_dt = xbuf_ref.dtype             # bf16 activation scratch
    inv_n = 1.0 / float(batch * seq)    # TRUE element count for BN stats

    # Zero ONLY the halo slabs (the conv's zero padding at l=-1 / l=L); the
    # middle n_pad rows are fully overwritten by the fc scatter below.
    zero_slab = jnp.zeros((b_pad, c0), act_dt)
    xbuf_ref[0:b_pad, :] = zero_slab
    xbuf_ref[b_pad + n_pad:2 * b_pad + n_pad, :] = zero_slab

    # Rows with b >= batch are padding.  The k=3 conv never mixes different
    # batch rows, so they only have to stay zero so the BN sums are exact.
    row_ok = (jax.lax.broadcasted_iota(jnp.int32, (n_pad, 1), 0) % b_pad
              < batch).astype(jnp.float32)

    # ---- fc, chunked per sequence position l (no live (B, 256*L) value) ----
    # fcw_ref[l] is (d_aug, 256): latent weights plus the bias as one extra
    # input-feature row (z carries a trailing 1 in valid rows, 0 elsewhere,
    # so padded rows come out exactly zero).
    zv = z_ref[...]

    def fc_chunk(l, carry):
        h = jnp.dot(zv, fcw_ref[l], preferred_element_type=jnp.float32)
        row0 = pl.multiple_of((l + 1) * b_pad, b_pad)
        xbuf_ref[pl.ds(row0, b_pad), :] = h.astype(act_dt)
        return carry

    jax.lax.fori_loop(0, seq, fc_chunk, 0, unroll=True)

    # ---- conv1 + BN1 + ReLU  (256 -> 128 channels) --------------------------
    y = _conv3_matmul(xbuf_ref, w1_ref, b_pad, n_pad, c0)
    y = _bn_relu(y, g1_ref[...], be1_ref[...], inv_n) * row_ok
    c1 = y.shape[-1]                                          # 128
    xbuf_ref[b_pad:b_pad + n_pad, 0:c1] = y.astype(act_dt)

    # ---- conv2 + BN2 + ReLU  (128 -> 64 real + 64 zero-padded channels) -----
    y = _conv3_matmul(xbuf_ref, w2_ref, b_pad, n_pad, c1)
    y = _bn_relu(y, g2_ref[...], be2_ref[...], inv_n)
    # No row mask needed here: padded rows feed only padded rows of the final
    # softmax (sliced off outside) and there is no further batch statistic.
    c2p = y.shape[-1]                                         # 128 (lane-dense)
    xbuf_ref[b_pad:b_pad + n_pad, 0:c2p] = y.astype(act_dt)

    # ---- conv3 + bias + softmax over the lane-padded vocab axis -------------
    logits = _conv3_matmul(xbuf_ref, w3_ref, b_pad, n_pad, c2p) + b3_ref[...]
    m = jnp.max(logits, axis=-1, keepdims=True)
    e = jnp.exp(logits - m)                     # padded lanes: exp(-1e30) == 0
    s = jnp.sum(e, axis=-1, keepdims=True)
    r = pl.reciprocal(s, approx=True)           # EUP reciprocal ...
    r = r * (2.0 - s * r)                       # ... + one Newton step
    o_ref[...] = e * r                          # (n_pad, Vpad) lane-dense store


# ---------------------------------------------------------------------------
# Host-side wrappers
# ---------------------------------------------------------------------------
def prepare_params(raw, seq_len, vocab_size, matmul_dtype=jnp.bfloat16):
    """One-time parameter prep (permute / tap-split / pad / cast).

    * fc weight (256L, D), row j = c*L + l, regrouped to (L, D, 256) so chunk
      l of the fc output is already channel-last; the bias becomes one extra
      input-feature row (sublane-padded to a multiple of 16 for bf16).
    * conv weights split into three per-tap (Cin, Cout) matrices stacked on a
      leading axis of 3; conv1/conv2 biases dropped (cancelled by train BN).
    * conv2 output channels / bn2 params zero-padded to 128 lanes; conv3 input
      rows padded to match and its vocab columns padded to a multiple of 128
      (bias -1e30 on padded lanes so they vanish under the softmax).
    """
    L, V = seq_len, vocab_size
    D = raw["fc_w"].shape[1]

    w = raw["fc_w"].reshape(C_FC, L, D).transpose(1, 2, 0)        # (L, D, 256)
    b = raw["fc_b"].reshape(C_FC, L).T                            # (L, 256)
    d_aug = -(-(D + 1) // ROW_TILE) * ROW_TILE
    fcw = jnp.zeros((L, d_aug, C_FC), jnp.float32)
    fcw = fcw.at[:, :D, :].set(w).at[:, D, :].set(b).astype(matmul_dtype)

    def taps(wc, cin_pad, cout_pad):
        # (Cout, Cin, 3) -> (3, Cin_pad, Cout_pad), zero-padded.
        cout, cin, _ = wc.shape
        t = jnp.transpose(wc, (2, 1, 0))
        t = jnp.pad(t, ((0, 0), (0, cin_pad - cin), (0, cout_pad - cout)))
        return t.astype(matmul_dtype)

    c1o = raw["c1_w"].shape[0]                                    # 128
    c2o = raw["c2_w"].shape[0]                                    # 64
    c2_pad = -(-c2o // 128) * 128
    v_pad = -(-V // 128) * 128

    b3 = jnp.full((v_pad,), NEG_INF, jnp.float32).at[:V].set(raw["c3_b"])

    return {
        "fc_w": fcw,
        "c1_w": taps(raw["c1_w"], C_FC, c1o),
        "bn1_g": raw["bn1_g"].reshape(1, -1).astype(jnp.float32),
        "bn1_b": raw["bn1_b"].reshape(1, -1).astype(jnp.float32),
        "c2_w": taps(raw["c2_w"], c1o, c2_pad),
        "bn2_g": jnp.pad(raw["bn2_g"], (0, c2_pad - c2o),
                         constant_values=1.0).reshape(1, -1).astype(jnp.float32),
        "bn2_b": jnp.pad(raw["bn2_b"], (0, c2_pad - c2o)
                         ).reshape(1, -1).astype(jnp.float32),
        "c3_w": taps(raw["c3_w"], c2_pad, v_pad),
        "c3_b": b3.reshape(1, v_pad),
    }


def generator_forward(z, prepped, seq_len, vocab_size):
    B, D = z.shape
    L = seq_len
    v_pad = prepped["c3_b"].shape[1]
    c0 = prepped["c1_w"].shape[1]                # 256
    d_aug = prepped["fc_w"].shape[1]

    # bf16 scratch packs 16 rows per sublane tile: pad the per-position batch
    # slab to 16 rows so every store / halo window is sublane-aligned.
    b_pad = -(-B // ROW_TILE) * ROW_TILE
    n_pad = L * b_pad
    scratch_rows = n_pad + 2 * b_pad

    # z with a trailing 1 column (the fc bias row); padded rows stay all-zero
    # so the fc output is exactly zero there.
    z_aug = jnp.zeros((b_pad, d_aug), jnp.float32)
    z_aug = z_aug.at[:B, :D].set(z).at[:B, D].set(1.0)
    z_aug = z_aug.astype(prepped["fc_w"].dtype)

    args = (z_aug, prepped["fc_w"],
            prepped["c1_w"], prepped["bn1_g"], prepped["bn1_b"],
            prepped["c2_w"], prepped["bn2_g"], prepped["bn2_b"],
            prepped["c3_w"], prepped["c3_b"])

    # VMEM budget from the actual buffer sizes (+ headroom for compiler
    # scratch); stays well inside v7x's 64 MiB at these shapes.
    vmem_bytes = (sum(int(a.size) * a.dtype.itemsize for a in args)
                  + n_pad * v_pad * 4                 # f32 output
                  + scratch_rows * c0 * 2)            # bf16 activation scratch
    vmem_limit = int(min(2 * vmem_bytes + (8 << 20), 96 << 20))

    vspec = pl.BlockSpec(memory_space=pltpu.MemorySpace.VMEM)
    out_flat = pl.pallas_call(
        functools.partial(generator_kernel, batch=B),
        out_shape=jax.ShapeDtypeStruct((n_pad, v_pad), jnp.float32),
        in_specs=[vspec] * len(args),
        out_specs=vspec,
        scratch_shapes=[pltpu.VMEM((scratch_rows, c0), jnp.bfloat16)],
        compiler_params=pltpu.CompilerParams(vmem_limit_bytes=vmem_limit),
    )(*args)

    # rows r = l*b_pad + b  ->  PyTorch NCL (B, V, L); drop the row/lane pads.
    return out_flat.reshape(L, b_pad, v_pad)[:, :B, :vocab_size].transpose(1, 2, 0)


# ---------------------------------------------------------------------------
# Pure-JAX reference (f32, mirrors the PyTorch module) for validation
# ---------------------------------------------------------------------------
def reference_forward(z, raw, seq_len):
    L = seq_len
    h = z @ raw["fc_w"].T + raw["fc_b"]                       # (B, 256*L)
    x = h.reshape(z.shape[0], C_FC, L)                        # NCL

    def conv1d(x, w, b):                                      # x (B,C,L), w (O,C,3)
        xp = jnp.pad(x, ((0, 0), (0, 0), (1, 1)))
        y = (jnp.einsum("oc,bcl->bol", w[:, :, 0], xp[:, :, 0:L])
             + jnp.einsum("oc,bcl->bol", w[:, :, 1], xp[:, :, 1:L + 1])
             + jnp.einsum("oc,bcl->bol", w[:, :, 2], xp[:, :, 2:L + 2]))
        return y + b[None, :, None]

    def bn(x, g, b):                                          # train-mode batch stats
        m = jnp.mean(x, axis=(0, 2), keepdims=True)
        v = jnp.var(x, axis=(0, 2), keepdims=True)            # biased
        return (x - m) / jnp.sqrt(v + BN_EPS) * g[None, :, None] + b[None, :, None]

    x = jax.nn.relu(bn(conv1d(x, raw["c1_w"], raw["c1_b"]), raw["bn1_g"], raw["bn1_b"]))
    x = jax.nn.relu(bn(conv1d(x, raw["c2_w"], raw["c2_b"]), raw["bn2_g"], raw["bn2_b"]))
    x = conv1d(x, raw["c3_w"], raw["c3_b"])
    return jax.nn.softmax(x, axis=1)                          # (B, V, L)


def init_params(key, latent_dim, seq_len, vocab_size):
    ks = jax.random.split(key, 8)
    f = 256 * seq_len

    def rnd(k, shape, scale):
        return (scale * jax.random.normal(k, shape)).astype(jnp.float32)

    return {
        "fc_w": rnd(ks[0], (f, latent_dim), 0.05),
        "fc_b": rnd(ks[1], (f,), 0.05),
        "c1_w": rnd(ks[2], (128, 256, 3), 0.05),
        "c1_b": rnd(ks[3], (128,), 0.05),
        "bn1_g": jnp.ones((128,), jnp.float32),
        "bn1_b": jnp.zeros((128,), jnp.float32),
        "c2_w": rnd(ks[4], (64, 128, 3), 0.05),
        "c2_b": rnd(ks[5], (64,), 0.05),
        "bn2_g": jnp.ones((64,), jnp.float32),
        "bn2_b": jnp.zeros((64,), jnp.float32),
        "c3_w": rnd(ks[6], (vocab_size, 64, 3), 0.05),
        "c3_b": rnd(ks[7], (vocab_size,), 0.05),
    }


if __name__ == "__main__":
    latent_dim, seq_len, vocab_size, batch = 32, 8, 16, 2

    key = jax.random.PRNGKey(0)
    pkey, zkey = jax.random.split(key)
    raw = init_params(pkey, latent_dim, seq_len, vocab_size)
    params = prepare_params(raw, seq_len, vocab_size)         # one-time prep
    z = jax.random.normal(zkey, (batch, latent_dim), dtype=jnp.float32)

    out = jax.block_until_ready(generator_forward(z, params, seq_len, vocab_size))

    assert out.shape == (batch, vocab_size, seq_len), out.shape
    assert bool(jnp.all(jnp.isfinite(out)))
    # softmax over the channel dim must sum to 1
    sums = jnp.sum(out, axis=1)
    assert bool(jnp.all(jnp.abs(sums - 1.0) < 1e-4))
    # match the pure-JAX f32 reference (kernel uses bf16 MXU operands)
    ref = reference_forward(z, raw, seq_len)
    max_err = float(jnp.max(jnp.abs(out - ref)))
    assert max_err < 2e-2, max_err
    print("KERNEL_OK")
</pallas_src>

<mosaic_0001>
module attributes {stable_mosaic.version = 11 : i64} {
  func.func @generator_kernel(%arg0: memref<16x48xbf16, #tpu.memory_space<vmem>>, %arg1: memref<8x48x256xbf16, #tpu.memory_space<vmem>>, %arg2: memref<3x256x128xbf16, #tpu.memory_space<vmem>>, %arg3: memref<1x128xf32, #tpu.memory_space<vmem>>, %arg4: memref<1x128xf32, #tpu.memory_space<vmem>>, %arg5: memref<3x128x128xbf16, #tpu.memory_space<vmem>>, %arg6: memref<1x128xf32, #tpu.memory_space<vmem>>, %arg7: memref<1x128xf32, #tpu.memory_space<vmem>>, %arg8: memref<3x128x128xbf16, #tpu.memory_space<vmem>>, %arg9: memref<1x128xf32, #tpu.memory_space<vmem>>, %arg10: memref<128x128xf32, #tpu.memory_space<vmem>>, %arg11: memref<160x256xbf16, #tpu.memory_space<vmem>>) attributes {dimension_semantics = [], scalar_prefetch = 0 : i64, scratch_operands = 1 : i64, tpu.core_type = #tpu.core_type<tc>} {
    %cst = arith.constant 0.000000e+00 : bf16
    %0 = vector.broadcast %cst : bf16 to vector<16x256xbf16>
    %c0 = arith.constant 0 : index
    %c0_0 = arith.constant 0 : index
    %1 = vector.load %arg11[%c0, %c0_0] : memref<160x256xbf16, #tpu.memory_space<vmem>>, vector<16x256xbf16>
    tpu.vector_store %arg11[%c0, %c0_0], %0 {strides = array<i32>} : memref<160x256xbf16, #tpu.memory_space<vmem>>, vector<16x256xbf16>,
    %c144 = arith.constant 144 : index
    %c0_1 = arith.constant 0 : index
    %2 = vector.load %arg11[%c144, %c0_1] : memref<160x256xbf16, #tpu.memory_space<vmem>>, vector<16x256xbf16>
    tpu.vector_store %arg11[%c144, %c0_1], %0 {strides = array<i32>} : memref<160x256xbf16, #tpu.memory_space<vmem>>, vector<16x256xbf16>,
    %3 = tpu.iota {dimensions = array<i32: 0>} : vector<128x1xi32>
    %c16_i32 = arith.constant 16 : i32
    %c0_i32 = arith.constant 0 : i32
    %4 = arith.cmpi eq, %c16_i32, %c0_i32 : i32
    %c1_i32 = arith.constant 1 : i32
    %5 = arith.select %4, %c1_i32, %c16_i32 : i32
    %6 = vector.broadcast %5 : i32 to vector<128x1xi32>
    %7 = arith.remsi %3, %6 : vector<128x1xi32>
    %c0_i32_2 = arith.constant 0 : i32
    %8 = vector.broadcast %c0_i32_2 : i32 to vector<128x1xi32>
    %9 = arith.cmpi ne, %7, %8 : vector<128x1xi32>
    %c0_i32_3 = arith.constant 0 : i32
    %10 = vector.broadcast %c0_i32_3 : i32 to vector<128x1xi32>
    %11 = arith.cmpi slt, %7, %10 : vector<128x1xi32>
    %c0_i32_4 = arith.constant 0 : i32
    %12 = arith.cmpi slt, %5, %c0_i32_4 : i32
    %13 = vector.broadcast %12 : i1 to vector<128x1xi1>
    %14 = vector.broadcast %13 : vector<128x1xi1> to vector<128x1xi1>
    %15 = arith.xori %11, %14 : vector<128x1xi1>
    %16 = arith.andi %15, %9 : vector<128x1xi1>
    %17 = vector.broadcast %5 : i32 to vector<128x1xi32>
    %18 = arith.addi %7, %17 : vector<128x1xi32>
    %19 = arith.select %16, %18, %7 : vector<128x1xi1>, vector<128x1xi32>
    %c2_i32 = arith.constant 2 : i32
    %20 = vector.broadcast %c2_i32 : i32 to vector<128x1xi32>
    %21 = arith.cmpi slt, %19, %20 : vector<128x1xi32>
    %22 = arith.extui %21 : vector<128x1xi1> to vector<128x1xi32>
    %23 = arith.sitofp %22 : vector<128x1xi32> to vector<128x1xf32>
    %c0_5 = arith.constant 0 : index
    %c0_6 = arith.constant 0 : index
    %24 = vector.load %arg0[%c0_5, %c0_6] : memref<16x48xbf16, #tpu.memory_space<vmem>>, vector<16x48xbf16>
    %c0_i32_7 = arith.constant 0 : i32
    %25 = arith.index_cast %c0_i32_7 : i32 to index
    %c0_8 = arith.constant 0 : index
    %c0_9 = arith.constant 0 : index
    %26 = vector.load %arg1[%25, %c0_8, %c0_9] : memref<8x48x256xbf16, #tpu.memory_space<vmem>>, vector<1x48x256xbf16>
    %27 = vector.shape_cast %26 : vector<1x48x256xbf16> to vector<48x256xbf16>
    %cst_10 = arith.constant dense<0.000000e+00> : vector<16x256xf32>
    %28 = tpu.matmul %24, %27, %cst_10 {dimension_numbers = #tpu.dot_dimension_numbers<[1], [0], [0], [1], [0, 0, 1, 1], [], []>} : vector<16x48xbf16>, vector<48x256xbf16>, vector<16x256xf32> -> vector<16x256xf32>
    %c1_i32_11 = arith.constant 1 : i32
    %29 = arith.addi %c0_i32_7, %c1_i32_11 : i32
    %c16_i32_12 = arith.constant 16 : i32
    %30 = arith.muli %29, %c16_i32_12 : i32
    %31 = tpu.assume_multiple %30, 16 : i32
    %32 = arith.truncf %28 : vector<16x256xf32> to vector<16x256xbf16>
    %33 = arith.index_cast %31 : i32 to index
    %c0_13 = arith.constant 0 : index
    %34 = vector.load %arg11[%33, %c0_13] : memref<160x256xbf16, #tpu.memory_space<vmem>>, vector<16x256xbf16>
    tpu.vector_store %arg11[%33, %c0_13], %32 {strides = array<i32>} : memref<160x256xbf16, #tpu.memory_space<vmem>>, vector<16x256xbf16>,
    %c1_i32_14 = arith.constant 1 : i32
    %35 = arith.index_cast %c1_i32_14 : i32 to index
    %c0_15 = arith.constant 0 : index
    %c0_16 = arith.constant 0 : index
    %36 = vector.load %arg1[%35, %c0_15, %c0_16] : memref<8x48x256xbf16, #tpu.memory_space<vmem>>, vector<1x48x256xbf16>
    %37 = vector.shape_cast %36 : vector<1x48x256xbf16> to vector<48x256xbf16>
    %cst_17 = arith.constant dense<0.000000e+00> : vector<16x256xf32>
    %38 = tpu.matmul %24, %37, %cst_17 {dimension_numbers = #tpu.dot_dimension_numbers<[1], [0], [0], [1], [0, 0, 1, 1], [], []>} : vector<16x48xbf16>, vector<48x256xbf16>, vector<16x256xf32> -> vector<16x256xf32>
    %c1_i32_18 = arith.constant 1 : i32
    %39 = arith.addi %c1_i32_14, %c1_i32_18 : i32
    %c16_i32_19 = arith.constant 16 : i32
    %40 = arith.muli %39, %c16_i32_19 : i32
    %41 = tpu.assume_multiple %40, 16 : i32
    %42 = arith.truncf %38 : vector<16x256xf32> to vector<16x256xbf16>
    %43 = arith.index_cast %41 : i32 to index
    %c0_20 = arith.constant 0 : index
    %44 = vector.load %arg11[%43, %c0_20] : memref<160x256xbf16, #tpu.memory_space<vmem>>, vector<16x256xbf16>
    tpu.vector_store %arg11[%43, %c0_20], %42 {strides = array<i32>} : memref<160x256xbf16, #tpu.memory_space<vmem>>, vector<16x256xbf16>,
    %c2_i32_21 = arith.constant 2 : i32
    %45 = arith.index_cast %c2_i32_21 : i32 to index
    %c0_22 = arith.constant 0 : index
    %c0_23 = arith.constant 0 : index
    %46 = vector.load %arg1[%45, %c0_22, %c0_23] : memref<8x48x256xbf16, #tpu.memory_space<vmem>>, vector<1x48x256xbf16>
    %47 = vector.shape_cast %46 : vector<1x48x256xbf16> to vector<48x256xbf16>
    %cst_24 = arith.constant dense<0.000000e+00> : vector<16x256xf32>
    %48 = tpu.matmul %24, %47, %cst_24 {dimension_numbers = #tpu.dot_dimension_numbers<[1], [0], [0], [1], [0, 0, 1, 1], [], []>} : vector<16x48xbf16>, vector<48x256xbf16>, vector<16x256xf32> -> vector<16x256xf32>
    %c1_i32_25 = arith.constant 1 : i32
    %49 = arith.addi %c2_i32_21, %c1_i32_25 : i32
    %c16_i32_26 = arith.constant 16 : i32
    %50 = arith.muli %49, %c16_i32_26 : i32
    %51 = tpu.assume_multiple %50, 16 : i32
    %52 = arith.truncf %48 : vector<16x256xf32> to vector<16x256xbf16>
    %53 = arith.index_cast %51 : i32 to index
    %c0_27 = arith.constant 0 : index
    %54 = vector.load %arg11[%53, %c0_27] : memref<160x256xbf16, #tpu.memory_space<vmem>>, vector<16x256xbf16>
    tpu.vector_store %arg11[%53, %c0_27], %52 {strides = array<i32>} : memref<160x256xbf16, #tpu.memory_space<vmem>>, vector<16x256xbf16>,
    %c3_i32 = arith.constant 3 : i32
    %55 = arith.index_cast %c3_i32 : i32 to index
    %c0_28 = arith.constant 0 : index
    %c0_29 = arith.constant 0 : index
    %56 = vector.load %arg1[%55, %c0_28, %c0_29] : memref<8x48x256xbf16, #tpu.memory_space<vmem>>, vector<1x48x256xbf16>
    %57 = vector.shape_cast %56 : vector<1x48x256xbf16> to vector<48x256xbf16>
    %cst_30 = arith.constant dense<0.000000e+00> : vector<16x256xf32>
    %58 = tpu.matmul %24, %57, %cst_30 {dimension_numbers = #tpu.dot_dimension_numbers<[1], [0], [0], [1], [0, 0, 1, 1], [], []>} : vector<16x48xbf16>, vector<48x256xbf16>, vector<16x256xf32> -> vector<16x256xf32>
    %c1_i32_31 = arith.constant 1 : i32
    %59 = arith.addi %c3_i32, %c1_i32_31 : i32
    %c16_i32_32 = arith.constant 16 : i32
    %60 = arith.muli %59, %c16_i32_32 : i32
    %61 = tpu.assume_multiple %60, 16 : i32
    %62 = arith.truncf %58 : vector<16x256xf32> to vector<16x256xbf16>
    %63 = arith.index_cast %61 : i32 to index
    %c0_33 = arith.constant 0 : index
    %64 = vector.load %arg11[%63, %c0_33] : memref<160x256xbf16, #tpu.memory_space<vmem>>, vector<16x256xbf16>
    tpu.vector_store %arg11[%63, %c0_33], %62 {strides = array<i32>} : memref<160x256xbf16, #tpu.memory_space<vmem>>, vector<16x256xbf16>,
    %c4_i32 = arith.constant 4 : i32
    %65 = arith.index_cast %c4_i32 : i32 to index
    %c0_34 = arith.constant 0 : index
    %c0_35 = arith.constant 0 : index
    %66 = vector.load %arg1[%65, %c0_34, %c0_35] : memref<8x48x256xbf16, #tpu.memory_space<vmem>>, vector<1x48x256xbf16>
    %67 = vector.shape_cast %66 : vector<1x48x256xbf16> to vector<48x256xbf16>
    %cst_36 = arith.constant dense<0.000000e+00> : vector<16x256xf32>
    %68 = tpu.matmul %24, %67, %cst_36 {dimension_numbers = #tpu.dot_dimension_numbers<[1], [0], [0], [1], [0, 0, 1, 1], [], []>} : vector<16x48xbf16>, vector<48x256xbf16>, vector<16x256xf32> -> vector<16x256xf32>
    %c1_i32_37 = arith.constant 1 : i32
    %69 = arith.addi %c4_i32, %c1_i32_37 : i32
    %c16_i32_38 = arith.constant 16 : i32
    %70 = arith.muli %69, %c16_i32_38 : i32
    %71 = tpu.assume_multiple %70, 16 : i32
    %72 = arith.truncf %68 : vector<16x256xf32> to vector<16x256xbf16>
    %73 = arith.index_cast %71 : i32 to index
    %c0_39 = arith.constant 0 : index
    %74 = vector.load %arg11[%73, %c0_39] : memref<160x256xbf16, #tpu.memory_space<vmem>>, vector<16x256xbf16>
    tpu.vector_store %arg11[%73, %c0_39], %72 {strides = array<i32>} : memref<160x256xbf16, #tpu.memory_space<vmem>>, vector<16x256xbf16>,
    %c5_i32 = arith.constant 5 : i32
    %75 = arith.index_cast %c5_i32 : i32 to index
    %c0_40 = arith.constant 0 : index
    %c0_41 = arith.constant 0 : index
    %76 = vector.load %arg1[%75, %c0_40, %c0_41] : memref<8x48x256xbf16, #tpu.memory_space<vmem>>, vector<1x48x256xbf16>
    %77 = vector.shape_cast %76 : vector<1x48x256xbf16> to vector<48x256xbf16>
    %cst_42 = arith.constant dense<0.000000e+00> : vector<16x256xf32>
    %78 = tpu.matmul %24, %77, %cst_42 {dimension_numbers = #tpu.dot_dimension_numbers<[1], [0], [0], [1], [0, 0, 1, 1], [], []>} : vector<16x48xbf16>, vector<48x256xbf16>, vector<16x256xf32> -> vector<16x256xf32>
    %c1_i32_43 = arith.constant 1 : i32
    %79 = arith.addi %c5_i32, %c1_i32_43 : i32
    %c16_i32_44 = arith.constant 16 : i32
    %80 = arith.muli %79, %c16_i32_44 : i32
    %81 = tpu.assume_multiple %80, 16 : i32
    %82 = arith.truncf %78 : vector<16x256xf32> to vector<16x256xbf16>
    %83 = arith.index_cast %81 : i32 to index
    %c0_45 = arith.constant 0 : index
    %84 = vector.load %arg11[%83, %c0_45] : memref<160x256xbf16, #tpu.memory_space<vmem>>, vector<16x256xbf16>
    tpu.vector_store %arg11[%83, %c0_45], %82 {strides = array<i32>} : memref<160x256xbf16, #tpu.memory_space<vmem>>, vector<16x256xbf16>,
    %c6_i32 = arith.constant 6 : i32
    %85 = arith.index_cast %c6_i32 : i32 to index
    %c0_46 = arith.constant 0 : index
    %c0_47 = arith.constant 0 : index
    %86 = vector.load %arg1[%85, %c0_46, %c0_47] : memref<8x48x256xbf16, #tpu.memory_space<vmem>>, vector<1x48x256xbf16>
    %87 = vector.shape_cast %86 : vector<1x48x256xbf16> to vector<48x256xbf16>
    %cst_48 = arith.constant dense<0.000000e+00> : vector<16x256xf32>
    %88 = tpu.matmul %24, %87, %cst_48 {dimension_numbers = #tpu.dot_dimension_numbers<[1], [0], [0], [1], [0, 0, 1, 1], [], []>} : vector<16x48xbf16>, vector<48x256xbf16>, vector<16x256xf32> -> vector<16x256xf32>
    %c1_i32_49 = arith.constant 1 : i32
    %89 = arith.addi %c6_i32, %c1_i32_49 : i32
    %c16_i32_50 = arith.constant 16 : i32
    %90 = arith.muli %89, %c16_i32_50 : i32
    %91 = tpu.assume_multiple %90, 16 : i32
    %92 = arith.truncf %88 : vector<16x256xf32> to vector<16x256xbf16>
    %93 = arith.index_cast %91 : i32 to index
    %c0_51 = arith.constant 0 : index
    %94 = vector.load %arg11[%93, %c0_51] : memref<160x256xbf16, #tpu.memory_space<vmem>>, vector<16x256xbf16>
    tpu.vector_store %arg11[%93, %c0_51], %92 {strides = array<i32>} : memref<160x256xbf16, #tpu.memory_space<vmem>>, vector<16x256xbf16>,
    %c7_i32 = arith.constant 7 : i32
    %95 = arith.index_cast %c7_i32 : i32 to index
    %c0_52 = arith.constant 0 : index
    %c0_53 = arith.constant 0 : index
    %96 = vector.load %arg1[%95, %c0_52, %c0_53] : memref<8x48x256xbf16, #tpu.memory_space<vmem>>, vector<1x48x256xbf16>
    %97 = vector.shape_cast %96 : vector<1x48x256xbf16> to vector<48x256xbf16>
    %cst_54 = arith.constant dense<0.000000e+00> : vector<16x256xf32>
    %98 = tpu.matmul %24, %97, %cst_54 {dimension_numbers = #tpu.dot_dimension_numbers<[1], [0], [0], [1], [0, 0, 1, 1], [], []>} : vector<16x48xbf16>, vector<48x256xbf16>, vector<16x256xf32> -> vector<16x256xf32>
    %c1_i32_55 = arith.constant 1 : i32
    %99 = arith.addi %c7_i32, %c1_i32_55 : i32
    %c16_i32_56 = arith.constant 16 : i32
    %100 = arith.muli %99, %c16_i32_56 : i32
    %101 = tpu.assume_multiple %100, 16 : i32
    %102 = arith.truncf %98 : vector<16x256xf32> to vector<16x256xbf16>
    %103 = arith.index_cast %101 : i32 to index
    %c0_57 = arith.constant 0 : index
    %104 = vector.load %arg11[%103, %c0_57] : memref<160x256xbf16, #tpu.memory_space<vmem>>, vector<16x256xbf16>
    tpu.vector_store %arg11[%103, %c0_57], %102 {strides = array<i32>} : memref<160x256xbf16, #tpu.memory_space<vmem>>, vector<16x256xbf16>,
    %c8_i32 = arith.constant 8 : i32
    %c0_58 = arith.constant 0 : index
    %c0_59 = arith.constant 0 : index
    %105 = vector.load %arg11[%c0_58, %c0_59] : memref<160x256xbf16, #tpu.memory_space<vmem>>, vector<128x256xbf16>
    %c16 = arith.constant 16 : index
    %c0_60 = arith.constant 0 : index
    %106 = vector.load %arg11[%c16, %c0_60] : memref<160x256xbf16, #tpu.memory_space<vmem>>, vector<128x256xbf16>
    %c32 = arith.constant 32 : index
    %c0_61 = arith.constant 0 : index
    %107 = vector.load %arg11[%c32, %c0_61] : memref<160x256xbf16, #tpu.memory_space<vmem>>, vector<128x256xbf16>
    %c0_62 = arith.constant 0 : index
    %c0_63 = arith.constant 0 : index
    %c0_64 = arith.constant 0 : index
    %108 = vector.load %arg2[%c0_62, %c0_63, %c0_64] : memref<3x256x128xbf16, #tpu.memory_space<vmem>>, vector<1x256x128xbf16>
    %109 = vector.shape_cast %108 : vector<1x256x128xbf16> to vector<256x128xbf16>
    %cst_65 = arith.constant dense<0.000000e+00> : vector<128x128xf32>
    %110 = tpu.matmul %105, %109, %cst_65 {dimension_numbers = #tpu.dot_dimension_numbers<[1], [0], [0], [1], [0, 0, 1, 1], [], []>} : vector<128x256xbf16>, vector<256x128xbf16>, vector<128x128xf32> -> vector<128x128xf32>
    %c1 = arith.constant 1 : index
    %c0_66 = arith.constant 0 : index
    %c0_67 = arith.constant 0 : index
    %111 = vector.load %arg2[%c1, %c0_66, %c0_67] : memref<3x256x128xbf16, #tpu.memory_space<vmem>>, vector<1x256x128xbf16>
    %112 = vector.shape_cast %111 : vector<1x256x128xbf16> to vector<256x128xbf16>
    %cst_68 = arith.constant dense<0.000000e+00> : vector<128x128xf32>
    %113 = tpu.matmul %106, %112, %cst_68 {dimension_numbers = #tpu.dot_dimension_numbers<[1], [0], [0], [1], [0, 0, 1, 1], [], []>} : vector<128x256xbf16>, vector<256x128xbf16>, vector<128x128xf32> -> vector<128x128xf32>
    %114 = arith.addf %110, %113 : vector<128x128xf32>
    %c2 = arith.constant 2 : index
    %c0_69 = arith.constant 0 : index
    %c0_70 = arith.constant 0 : index
    %115 = vector.load %arg2[%c2, %c0_69, %c0_70] : memref<3x256x128xbf16, #tpu.memory_space<vmem>>, vector<1x256x128xbf16>
    %116 = vector.shape_cast %115 : vector<1x256x128xbf16> to vector<256x128xbf16>
    %cst_71 = arith.constant dense<0.000000e+00> : vector<128x128xf32>
    %117 = tpu.matmul %107, %116, %cst_71 {dimension_numbers = #tpu.dot_dimension_numbers<[1], [0], [0], [1], [0, 0, 1, 1], [], []>} : vector<128x256xbf16>, vector<256x128xbf16>, vector<128x128xf32> -> vector<128x128xf32>
    %118 = arith.addf %114, %117 : vector<128x128xf32>
    %c0_72 = arith.constant 0 : index
    %c0_73 = arith.constant 0 : index
    %119 = vector.load %arg3[%c0_72, %c0_73] : memref<1x128xf32, #tpu.memory_space<vmem>>, vector<1x128xf32>
    %c0_74 = arith.constant 0 : index
    %c0_75 = arith.constant 0 : index
    %120 = vector.load %arg4[%c0_74, %c0_75] : memref<1x128xf32, #tpu.memory_space<vmem>>, vector<1x128xf32>
    %cst_76 = arith.constant dense<0.000000e+00> : vector<128xf32>
    %121 = vector.multi_reduction <add>, %118, %cst_76 [0] : vector<128x128xf32> to vector<128xf32>
    %122 = vector.shape_cast %121 : vector<128xf32> to vector<1x128xf32>
    %cst_77 = arith.constant 6.250000e-02 : f32
    %123 = vector.broadcast %cst_77 : f32 to vector<1x128xf32>
    %124 = arith.mulf %122, %123 : vector<1x128xf32>
    %125 = arith.mulf %118, %118 : vector<128x128xf32>
    %cst_78 = arith.constant dense<0.000000e+00> : vector<128xf32>
    %126 = vector.multi_reduction <add>, %125, %cst_78 [0] : vector<128x128xf32> to vector<128xf32>
    %127 = vector.shape_cast %126 : vector<128xf32> to vector<1x128xf32>
    %cst_79 = arith.constant 6.250000e-02 : f32
    %128 = vector.broadcast %cst_79 : f32 to vector<1x128xf32>
    %129 = arith.mulf %127, %128 : vector<1x128xf32>
    %130 = arith.mulf %124, %124 : vector<1x128xf32>
    %131 = arith.subf %129, %130 : vector<1x128xf32>
    %cst_80 = arith.constant 0.000000e+00 : f32
    %132 = vector.broadcast %cst_80 : f32 to vector<1x128xf32>
    %133 = arith.maximumf %131, %132 : vector<1x128xf32>
    %cst_81 = arith.constant 9.99999974E-6 : f32
    %134 = vector.broadcast %cst_81 : f32 to vector<1x128xf32>
    %135 = arith.addf %133, %134 : vector<1x128xf32>
    %136 = math.rsqrt %135 : vector<1x128xf32>
    %137 = arith.mulf %119, %136 : vector<1x128xf32>
    %138 = arith.mulf %124, %137 : vector<1x128xf32>
    %139 = arith.subf %120, %138 : vector<1x128xf32>
    %140 = vector.broadcast %137 : vector<1x128xf32> to vector<128x128xf32>
    %141 = arith.mulf %118, %140 : vector<128x128xf32>
    %142 = vector.broadcast %139 : vector<1x128xf32> to vector<128x128xf32>
    %143 = arith.addf %141, %142 : vector<128x128xf32>
    %cst_82 = arith.constant 0.000000e+00 : f32
    %144 = vector.broadcast %cst_82 : f32 to vector<128x128xf32>
    %145 = arith.maximumf %143, %144 : vector<128x128xf32>
    %146 = vector.broadcast %23 : vector<128x1xf32> to vector<128x128xf32>
    %147 = arith.mulf %145, %146 : vector<128x128xf32>
    %148 = arith.truncf %147 : vector<128x128xf32> to vector<128x128xbf16>
    %c16_83 = arith.constant 16 : index
    %c0_84 = arith.constant 0 : index
    %149 = vector.load %arg11[%c16_83, %c0_84] : memref<160x256xbf16, #tpu.memory_space<vmem>>, vector<128x128xbf16>
    tpu.vector_store %arg11[%c16_83, %c0_84], %148 {strides = array<i32>} : memref<160x256xbf16, #tpu.memory_space<vmem>>, vector<128x128xbf16>,
    %c0_85 = arith.constant 0 : index
    %c0_86 = arith.constant 0 : index
    %150 = vector.load %arg11[%c0_85, %c0_86] : memref<160x256xbf16, #tpu.memory_space<vmem>>, vector<128x128xbf16>
    %c16_87 = arith.constant 16 : index
    %c0_88 = arith.constant 0 : index
    %151 = vector.load %arg11[%c16_87, %c0_88] : memref<160x256xbf16, #tpu.memory_space<vmem>>, vector<128x128xbf16>
    %c32_89 = arith.constant 32 : index
    %c0_90 = arith.constant 0 : index
    %152 = vector.load %arg11[%c32_89, %c0_90] : memref<160x256xbf16, #tpu.memory_space<vmem>>, vector<128x128xbf16>
    %c0_91 = arith.constant 0 : index
    %c0_92 = arith.constant 0 : index
    %c0_93 = arith.constant 0 : index
    %153 = vector.load %arg5[%c0_91, %c0_92, %c0_93] : memref<3x128x128xbf16, #tpu.memory_space<vmem>>, vector<1x128x128xbf16>
    %154 = vector.shape_cast %153 : vector<1x128x128xbf16> to vector<128x128xbf16>
    %cst_94 = arith.constant dense<0.000000e+00> : vector<128x128xf32>
    %155 = tpu.matmul %150, %154, %cst_94 {dimension_numbers = #tpu.dot_dimension_numbers<[1], [0], [0], [1], [0, 0, 1, 1], [], []>} : vector<128x128xbf16>, vector<128x128xbf16>, vector<128x128xf32> -> vector<128x128xf32>
    %c1_95 = arith.constant 1 : index
    %c0_96 = arith.constant 0 : index
    %c0_97 = arith.constant 0 : index
    %156 = vector.load %arg5[%c1_95, %c0_96, %c0_97] : memref<3x128x128xbf16, #tpu.memory_space<vmem>>, vector<1x128x128xbf16>
    %157 = vector.shape_cast %156 : vector<1x128x128xbf16> to vector<128x128xbf16>
    %cst_98 = arith.constant dense<0.000000e+00> : vector<128x128xf32>
    %158 = tpu.matmul %151, %157, %cst_98 {dimension_numbers = #tpu.dot_dimension_numbers<[1], [0], [0], [1], [0, 0, 1, 1], [], []>} : vector<128x128xbf16>, vector<128x128xbf16>, vector<128x128xf32> -> vector<128x128xf32>
    %159 = arith.addf %155, %158 : vector<128x128xf32>
    %c2_99 = arith.constant 2 : index
    %c0_100 = arith.constant 0 : index
    %c0_101 = arith.constant 0 : index
    %160 = vector.load %arg5[%c2_99, %c0_100, %c0_101] : memref<3x128x128xbf16, #tpu.memory_space<vmem>>, vector<1x128x128xbf16>
    %161 = vector.shape_cast %160 : vector<1x128x128xbf16> to vector<128x128xbf16>
    %cst_102 = arith.constant dense<0.000000e+00> : vector<128x128xf32>
    %162 = tpu.matmul %152, %161, %cst_102 {dimension_numbers = #tpu.dot_dimension_numbers<[1], [0], [0], [1], [0, 0, 1, 1], [], []>} : vector<128x128xbf16>, vector<128x128xbf16>, vector<128x128xf32> -> vector<128x128xf32>
    %163 = arith.addf %159, %162 : vector<128x128xf32>
    %c0_103 = arith.constant 0 : index
    %c0_104 = arith.constant 0 : index
    %164 = vector.load %arg6[%c0_103, %c0_104] : memref<1x128xf32, #tpu.memory_space<vmem>>, vector<1x128xf32>
    %c0_105 = arith.constant 0 : index
    %c0_106 = arith.constant 0 : index
    %165 = vector.load %arg7[%c0_105, %c0_106] : memref<1x128xf32, #tpu.memory_space<vmem>>, vector<1x128xf32>
    %cst_107 = arith.constant dense<0.000000e+00> : vector<128xf32>
    %166 = vector.multi_reduction <add>, %163, %cst_107 [0] : vector<128x128xf32> to vector<128xf32>
    %167 = vector.shape_cast %166 : vector<128xf32> to vector<1x128xf32>
    %cst_108 = arith.constant 6.250000e-02 : f32
    %168 = vector.broadcast %cst_108 : f32 to vector<1x128xf32>
    %169 = arith.mulf %167, %168 : vector<1x128xf32>
    %170 = arith.mulf %163, %163 : vector<128x128xf32>
    %cst_109 = arith.constant dense<0.000000e+00> : vector<128xf32>
    %171 = vector.multi_reduction <add>, %170, %cst_109 [0] : vector<128x128xf32> to vector<128xf32>
    %172 = vector.shape_cast %171 : vector<128xf32> to vector<1x128xf32>
    %cst_110 = arith.constant 6.250000e-02 : f32
    %173 = vector.broadcast %cst_110 : f32 to vector<1x128xf32>
    %174 = arith.mulf %172, %173 : vector<1x128xf32>
    %175 = arith.mulf %169, %169 : vector<1x128xf32>
    %176 = arith.subf %174, %175 : vector<1x128xf32>
    %cst_111 = arith.constant 0.000000e+00 : f32
    %177 = vector.broadcast %cst_111 : f32 to vector<1x128xf32>
    %178 = arith.maximumf %176, %177 : vector<1x128xf32>
    %cst_112 = arith.constant 9.99999974E-6 : f32
    %179 = vector.broadcast %cst_112 : f32 to vector<1x128xf32>
    %180 = arith.addf %178, %179 : vector<1x128xf32>
    %181 = math.rsqrt %180 : vector<1x128xf32>
    %182 = arith.mulf %164, %181 : vector<1x128xf32>
    %183 = arith.mulf %169, %182 : vector<1x128xf32>
    %184 = arith.subf %165, %183 : vector<1x128xf32>
    %185 = vector.broadcast %182 : vector<1x128xf32> to vector<128x128xf32>
    %186 = arith.mulf %163, %185 : vector<128x128xf32>
    %187 = vector.broadcast %184 : vector<1x128xf32> to vector<128x128xf32>
    %188 = arith.addf %186, %187 : vector<128x128xf32>
    %cst_113 = arith.constant 0.000000e+00 : f32
    %189 = vector.broadcast %cst_113 : f32 to vector<128x128xf32>
    %190 = arith.maximumf %188, %189 : vector<128x128xf32>
    %191 = arith.truncf %190 : vector<128x128xf32> to vector<128x128xbf16>
    %c16_114 = arith.constant 16 : index
    %c0_115 = arith.constant 0 : index
    %192 = vector.load %arg11[%c16_114, %c0_115] : memref<160x256xbf16, #tpu.memory_space<vmem>>, vector<128x128xbf16>
    tpu.vector_store %arg11[%c16_114, %c0_115], %191 {strides = array<i32>} : memref<160x256xbf16, #tpu.memory_space<vmem>>, vector<128x128xbf16>,
    %c0_116 = arith.constant 0 : index
    %c0_117 = arith.constant 0 : index
    %193 = vector.load %arg11[%c0_116, %c0_117] : memref<160x256xbf16, #tpu.memory_space<vmem>>, vector<128x128xbf16>
    %c16_118 = arith.constant 16 : index
    %c0_119 = arith.constant 0 : index
    %194 = vector.load %arg11[%c16_118, %c0_119] : memref<160x256xbf16, #tpu.memory_space<vmem>>, vector<128x128xbf16>
    %c32_120 = arith.constant 32 : index
    %c0_121 = arith.constant 0 : index
    %195 = vector.load %arg11[%c32_120, %c0_121] : memref<160x256xbf16, #tpu.memory_space<vmem>>, vector<128x128xbf16>
    %c0_122 = arith.constant 0 : index
    %c0_123 = arith.constant 0 : index
    %c0_124 = arith.constant 0 : index
    %196 = vector.load %arg8[%c0_122, %c0_123, %c0_124] : memref<3x128x128xbf16, #tpu.memory_space<vmem>>, vector<1x128x128xbf16>
    %197 = vector.shape_cast %196 : vector<1x128x128xbf16> to vector<128x128xbf16>
    %cst_125 = arith.constant dense<0.000000e+00> : vector<128x128xf32>
    %198 = tpu.matmul %193, %197, %cst_125 {dimension_numbers = #tpu.dot_dimension_numbers<[1], [0], [0], [1], [0, 0, 1, 1], [], []>} : vector<128x128xbf16>, vector<128x128xbf16>, vector<128x128xf32> -> vector<128x128xf32>
    %c1_126 = arith.constant 1 : index
    %c0_127 = arith.constant 0 : index
    %c0_128 = arith.constant 0 : index
    %199 = vector.load %arg8[%c1_126, %c0_127, %c0_128] : memref<3x128x128xbf16, #tpu.memory_space<vmem>>, vector<1x128x128xbf16>
    %200 = vector.shape_cast %199 : vector<1x128x128xbf16> to vector<128x128xbf16>
    %cst_129 = arith.constant dense<0.000000e+00> : vector<128x128xf32>
    %201 = tpu.matmul %194, %200, %cst_129 {dimension_numbers = #tpu.dot_dimension_numbers<[1], [0], [0], [1], [0, 0, 1, 1], [], []>} : vector<128x128xbf16>, vector<128x128xbf16>, vector<128x128xf32> -> vector<128x128xf32>
    %202 = arith.addf %198, %201 : vector<128x128xf32>
    %c2_130 = arith.constant 2 : index
    %c0_131 = arith.constant 0 : index
    %c0_132 = arith.constant 0 : index
    %203 = vector.load %arg8[%c2_130, %c0_131, %c0_132] : memref<3x128x128xbf16, #tpu.memory_space<vmem>>, vector<1x128x128xbf16>
    %204 = vector.shape_cast %203 : vector<1x128x128xbf16> to vector<128x128xbf16>
    %cst_133 = arith.constant dense<0.000000e+00> : vector<128x128xf32>
    %205 = tpu.matmul %195, %204, %cst_133 {dimension_numbers = #tpu.dot_dimension_numbers<[1], [0], [0], [1], [0, 0, 1, 1], [], []>} : vector<128x128xbf16>, vector<128x128xbf16>, vector<128x128xf32> -> vector<128x128xf32>
    %206 = arith.addf %202, %205 : vector<128x128xf32>
    %c0_134 = arith.constant 0 : index
    %c0_135 = arith.constant 0 : index
    %207 = vector.load %arg9[%c0_134, %c0_135] : memref<1x128xf32, #tpu.memory_space<vmem>>, vector<1x128xf32>
    %208 = vector.broadcast %207 : vector<1x128xf32> to vector<128x128xf32>
    %209 = arith.addf %206, %208 : vector<128x128xf32>
    %cst_136 = arith.constant dense<0xFF800000> : vector<128xf32>
    %210 = vector.multi_reduction <maximumf>, %209, %cst_136 [1] : vector<128x128xf32> to vector<128xf32>
    %211 = vector.shape_cast %210 : vector<128xf32> to vector<128x1xf32>
    %212 = vector.broadcast %211 : vector<128x1xf32> to vector<128x128xf32>
    %213 = arith.subf %209, %212 : vector<128x128xf32>
    %214 = math.exp %213 : vector<128x128xf32>
    %cst_137 = arith.constant dense<0.000000e+00> : vector<128xf32>
    %215 = vector.multi_reduction <add>, %214, %cst_137 [1] : vector<128x128xf32> to vector<128xf32>
    %216 = vector.shape_cast %215 : vector<128xf32> to vector<128x1xf32>
    %217 = tpu.reciprocal %216 {approx = true} : vector<128x1xf32> -> vector<128x1xf32>
    %218 = arith.mulf %216, %217 : vector<128x1xf32>
    %cst_138 = arith.constant 2.000000e+00 : f32
    %219 = vector.broadcast %cst_138 : f32 to vector<128x1xf32>
    %220 = arith.subf %219, %218 : vector<128x1xf32>
    %221 = arith.mulf %217, %220 : vector<128x1xf32>
    %222 = vector.broadcast %221 : vector<128x1xf32> to vector<128x128xf32>
    %223 = arith.mulf %214, %222 : vector<128x128xf32>
    %c0_139 = arith.constant 0 : index
    %c0_140 = arith.constant 0 : index
    %224 = vector.load %arg10[%c0_139, %c0_140] : memref<128x128xf32, #tpu.memory_space<vmem>>, vector<128x128xf32>
    tpu.vector_store %arg10[%c0_139, %c0_140], %223 {strides = array<i32>} : memref<128x128xf32, #tpu.memory_space<vmem>>, vector<128x128xf32>,
    return
  }
}

</mosaic_0001>

<bundles_post_ra>
// kernel: tpu_custom_call.1
= control target key start
LH: loop header
LB: loop body
LE: loop exit
PB: predicated region body
PF: predicated region fallthrough
CT: control target
= control target key end

     0   :  { %15 = vsyncpa [#allocation4], 0  ;;  %s5247_s0 = inlined_call_operand.hbm [shape: bf16[16,48], index: 0, kind: input, shape index: {}]   ;;  %s5248_s1 = inlined_call_operand.hbm [shape: bf16[8,48,256], index: 1, kind: input, shape index: {}]   ;;  %s5249_s2 = inlined_call_operand.hbm [shape: bf16[3,256,128], index: 2, kind: input, shape index: {}]   ;;  %s5250_s3 = inlined_call_operand.vmem [shape: f32[1,128], index: 3, kind: input, shape index: {}]   ;;  %s5251_s4 = inlined_call_operand.vmem [shape: f32[1,128], index: 4, kind: input, shape index: {}]   ;;  %s5252_s5 = inlined_call_operand.hbm [shape: bf16[3,128,128], index: 5, kind: input, shape index: {}]   ;;  %s5253_s6 = inlined_call_operand.vmem [shape: f32[1,128], index: 6, kind: input, shape index: {}]   ;;  %s5254_s7 = inlined_call_operand.vmem [shape: f32[1,128], index: 7, kind: input, shape index: {}]   ;;  %s5255_s8 = inlined_call_operand.hbm [shape: bf16[3,128,128], index: 8, kind: input, shape index: {}]   ;;  %s5256_s9 = inlined_call_operand.vmem [shape: f32[1,128], index: 9, kind: input, shape index: {}]   ;;  %s5257_s10 = inlined_call_operand.hbm [shape: f32[128,128], index: 10, kind: output, shape index: {}]  }
   0x1   :  { %16 = vsyncpa [#allocation7], 0 }
   0x2   :  { %17 = vsyncpa [#allocation10], 0 }
   0x3   :  { %18 = vsyncpa [#allocation5], 0  ;;  %s4498_s13 = smov [#allocation6]   ;;  %s4358_s17 = scalar_lea.hbm %s5248_s1, 6144 }
   0x4   :  { %s36_s14 = sshll.u32 %s4498_s13, 4  ;;  %p4359_p0 = scmp.ne.s32.totalorder %s5248_s1, %s4358_s17  ;;  %s37_s14 = int_to_ptr.vmem [resolvable:$true] %s36_s14 }
   0x5   :  { %p4362_p1 = scmp.lt.u32.totalorder %s4358_s17, %s5248_s1 }
   0x7   :  { %p4364_p2 = pnand %p4362_p1, %p4359_p0 }
   0x9   :  { %4367 = shalt.err (!%p4364_p2)
}
   0xa   :  { %s4368_s22 = scalar_lea.vmem %s37_s14, 6144  ;;  %p4373_p4 = scmp.lt.s32.totalorder %s37_s14, %s37_s14 }
   0xb   :  { %p4369_p3 = scmp.ne.s32.totalorder %s37_s14, %s4368_s22  ;;  %p4374_p5 = scmp.lt.s32.totalorder %s4368_s22, %s4368_s22 }
   0xd   :  { %p4375_p6 = por %p4374_p5, %p4373_p4 }
   0xf   :  { %p4376_p7 = pnand %p4375_p6, %p4369_p3 }
  0x11   :  { %4379 = shalt.err (!%p4376_p7)
}
  0x12   :  { %s4499_s23 = smov 128   ;;  %s4500_s24 = smov 8  }
  0x13   :  { %42 = dma.hbm_to_vmem [thread:$0]  %s5248_s1, 6144, %s37_s14, [#allocation7], %s4499_s23, %s4499_s23, %s4500_s24  }
  0x14   :  { %s4501_s27 = smov [#allocation9]   ;;  %s4502_s29 = smov [#allocation3]  }
  0x15   :  { %s64_s28 = sshll.u32 %s4501_s27, 4  ;;  %s24_s30 = sshll.u32 %s4502_s29, 4  ;;  %s65_s28 = int_to_ptr.vmem [resolvable:$true] %s64_s28  ;;  %s25_s30 = int_to_ptr.vmem [resolvable:$true] %s24_s30 }
  0x16   :  { %s4380_s13 = scalar_lea.hbm %s5252_s5, 3072 }
  0x17   :  { %p4381_p8 = scmp.ne.s32.totalorder %s5252_s5, %s4380_s13  ;;  %p4384_p9 = scmp.lt.u32.totalorder %s4380_s13, %s5252_s5 }
  0x19   :  { %p4386_p10 = pnand %p4384_p9, %p4381_p8 }
  0x1b   :  { %4389 = shalt.err (!%p4386_p10)
}
  0x1c   :  { %s4390_s1 = scalar_lea.vmem %s65_s28, 3072  ;;  %p4395_p12 = scmp.lt.s32.totalorder %s65_s28, %s65_s28 }
  0x1d   :  { %p4391_p11 = scmp.ne.s32.totalorder %s65_s28, %s4390_s1  ;;  %p4396_p13 = scmp.lt.s32.totalorder %s4390_s1, %s4390_s1 }
  0x1f   :  { %p4397_p0 = por %p4396_p13, %p4395_p12 }
  0x21   :  { %p4398_p1 = pnand %p4397_p0, %p4391_p11 }
  0x23   :  { %4401 = shalt.err (!%p4398_p1)
}
  0x24   :  { %s4503_s14 = smov 64   ;;  %s4504_s19 = smov 4  }
  0x25   :  { %70 = dma.hbm_to_vmem [thread:$0]  %s5252_s5, 3072, %s65_s28, [#allocation10], %s4503_s14, %s4503_s14, %s4504_s19  }
  0x26   :  { %s4402_s26 = scalar_lea.hbm %s5247_s0, 128 }
  0x27   :  { %p4403_p2 = scmp.ne.s32.totalorder %s5247_s0, %s4402_s26  ;;  %p4406_p3 = scmp.lt.u32.totalorder %s4402_s26, %s5247_s0 }
  0x29   :  { %p4408_p4 = pnand %p4406_p3, %p4403_p2 }
  0x2b   :  { %4411 = shalt.err (!%p4408_p4)
}
  0x2c   :  { %s4412_s13 = scalar_lea.vmem %s25_s30, 128  ;;  %p4417_p6 = scmp.lt.s32.totalorder %s25_s30, %s25_s30 }
  0x2d   :  { %p4413_p5 = scmp.ne.s32.totalorder %s25_s30, %s4412_s13  ;;  %p4418_p7 = scmp.lt.s32.totalorder %s4412_s13, %s4412_s13 }
  0x2f   :  { %p4419_p8 = por %p4418_p7, %p4417_p6 }
  0x31   :  { %p4420_p9 = pnand %p4419_p8, %p4413_p5 }
  0x33   :  { %4423 = shalt.err (!%p4420_p9)
}
  0x34   :  { %30 = dma.hbm_to_vmem [thread:$0]  %s5247_s0, 128, %s25_s30, [#allocation4], %s4503_s14, %s4503_s14, %s4504_s19  }
  0x35   :  { %s4505_s15 = smov [#allocation8]   ;;  %s4506_s17 = smov [#allocation11]  }
  0x36   :  { %s48_s16 = sshll.u32 %s4505_s15, 4  ;;  %s80_s18 = sshll.u32 %s4506_s17, 4  ;;  %s49_s16 = int_to_ptr.vmem [resolvable:$true] %s48_s16  ;;  %s81_s18 = int_to_ptr.vmem [resolvable:$true] %s80_s18 }
  0x37   :  { %s4424_s21 = scalar_lea.hbm %s5249_s2, 6144 }
  0x38   :  { %p4425_p10 = scmp.ne.s32.totalorder %s5249_s2, %s4424_s21  ;;  %p4428_p11 = scmp.lt.u32.totalorder %s4424_s21, %s5249_s2 }
  0x3a   :  { %p4430_p12 = pnand %p4428_p11, %p4425_p10 }
  0x3c   :  { %4433 = shalt.err (!%p4430_p12)
}
  0x3d   :  { %s4434_s0 = scalar_lea.vmem %s49_s16, 6144  ;;  %p4439_p0 = scmp.lt.s32.totalorder %s49_s16, %s49_s16 }
  0x3e   :  { %p4435_p13 = scmp.ne.s32.totalorder %s49_s16, %s4434_s0  ;;  %p4440_p1 = scmp.lt.s32.totalorder %s4434_s0, %s4434_s0 }
  0x40   :  { %p4441_p2 = por %p4440_p1, %p4439_p0 }
  0x42   :  { %p4442_p3 = pnand %p4441_p2, %p4435_p13 }
  0x44   :  { %4445 = shalt.err (!%p4442_p3)
}
  0x45   :  { %54 = dma.hbm_to_vmem [thread:$0]  %s5249_s2, 6144, %s49_s16, [#allocation7], %s4503_s14, %s4503_s14, %s4504_s19  }
  0x46   :  { %s4446_s13 = scalar_lea.hbm %s5255_s8, 3072 }
  0x47   :  { %p4447_p4 = scmp.ne.s32.totalorder %s5255_s8, %s4446_s13  ;;  %p4450_p5 = scmp.lt.u32.totalorder %s4446_s13, %s5255_s8 }
  0x49   :  { %p4452_p6 = pnand %p4450_p5, %p4447_p4 }
  0x4b   :  { %4455 = shalt.err (!%p4452_p6)
}
  0x4c   :  { %s4456_s1 = scalar_lea.vmem %s81_s18, 3072  ;;  %p4461_p8 = scmp.lt.s32.totalorder %s81_s18, %s81_s18 }
  0x4d   :  { %p4457_p7 = scmp.ne.s32.totalorder %s81_s18, %s4456_s1  ;;  %p4462_p9 = scmp.lt.s32.totalorder %s4456_s1, %s4456_s1 }
  0x4f   :  { %p4463_p10 = por %p4462_p9, %p4461_p8 }
  0x51   :  { %p4464_p11 = pnand %p4463_p10, %p4457_p7 }
  0x53   :  { %4467 = shalt.err (!%p4464_p11)
}
  0x54   :  { %86 = dma.hbm_to_vmem [thread:$0]  %s5255_s8, 3072, %s81_s18, [#allocation10], %s4503_s14, %s4503_s14, %s4504_s19  }
  0x55   :  { %4490 = dma.done.wait [#allocation4], 128  }
  0x56   :  { %4491 = vsyncadd [#allocation4], 4294967168 }
  0x57   :  { %4492 = dma.done.wait [#allocation7], 12288  }
  0x58   :  { %4493 = vsyncadd [#allocation7], 4294955008 }
  0x59   :  { %4494 = dma.done.wait [#allocation10], 6144  }
  0x5a   :  { %4495 = vsyncadd [#allocation10], 4294961152  ;;  %v4507_v0 = vmov 0   ;;  %v4121_v1 = vld [vmem:[#allocation6 + $0x4] ss:$8 sps:$4 sm:$0xff]   ;;  %v4642_v11 = vld [vmem:[#allocation3] sm:$0xff]  }
  0x5b   :  { %445 = vmatprep.mubr.bf16.mxu0 %v4507_v0  ;;  %532 = vmatprep.mubr.bf16.mxu1 %v4507_v0  ;;  %v4123_v2 = vld [vmem:[#allocation6] ss:$8 sps:$4 sm:$0xff]   ;;  %v4124_v3 = vld [vmem:[#allocation6 + $0x14] ss:$8 sps:$4 sm:$0xff]   ;;  %v4126_v4 = vld [vmem:[#allocation6 + $0x10] ss:$8 sps:$4 sm:$0xff]  }
  0x5c   :  { %413 = vmatprep.subr.bf16.mxu0 %v4121_v1  ;;  %v4127_v5 = vld [vmem:[#allocation6 + $0x34] ss:$8 sps:$4 sm:$0xff]   ;;  %v4129_v6 = vld [vmem:[#allocation6 + $0x30] ss:$8 sps:$4 sm:$0xff]   ;;  %v4130_v7 = vld [vmem:[#allocation6 + $0x24] ss:$8 sps:$4 sm:$0xff]  }
  0x5d   :  { %414 = vmatpush1.bf16.msra.mxu0 %v4123_v2  ;;  %500 = vmatprep.subr.bf16.mxu1 %v4127_v5  ;;  %v4133_v8 = vld [vmem:[#allocation6 + $0x44] ss:$8 sps:$4 sm:$0xff]   ;;  %v4135_v9 = vld [vmem:[#allocation6 + $0x40] ss:$8 sps:$4 sm:$0xff]   ;;  %v4140_v13 = vld [vmem:[#allocation6 + $0x54] ss:$8 sps:$4 sm:$0xff]  }
  0x5e   :  { %415 = vmatprep.subr.bf16.mxu0 %v4124_v3  ;;  %501 = vmatpush1.bf16.msra.mxu1 %v4129_v6  ;;  %v4132_v10 = vld [vmem:[#allocation6 + $0x20] ss:$8 sps:$4 sm:$0xff]   ;;  %v4139_v12 = vld [vmem:[#allocation6 + $0x64] ss:$8 sps:$4 sm:$0xff]   ;;  %v4142_v14 = vld [vmem:[#allocation6 + $0x50] ss:$8 sps:$4 sm:$0xff]  }
  0x5f   :  { %502 = vmatprep.subr.bf16.mxu1 %v4133_v8  ;;  %vm409_vm0 = vcmask 392192   ;;  %v4137_v15 = vld [vmem:[#allocation6 + $0x60] ss:$8 sps:$4 sm:$0xff]   ;;  %v4145_v16 = vld [vmem:[#allocation6 + $0x74] ss:$8 sps:$4 sm:$0xff]  }
  0x60   :  { %v4148_v17 = vld [vmem:[#allocation6 + $0x94] ss:$8 sps:$4 sm:$0xff]   ;;  %v4146_v18 = vld [vmem:[#allocation6 + $0x90] ss:$8 sps:$4 sm:$0xff]   ;;  %v4154_v20 = vld [vmem:[#allocation6 + $0xa4] ss:$8 sps:$4 sm:$0xff]  }
  0x61   :  { %416 = vmatpush1.bf16.msra.mxu0 %v4126_v4  ;;  %v4143_v19 = vld [vmem:[#allocation6 + $0x70] ss:$8 sps:$4 sm:$0xff]   ;;  %v4151_v21 = vld [vmem:[#allocation6 + $0x84] ss:$8 sps:$4 sm:$0xff]   ;;  %v4152_v22 = vld [vmem:[#allocation6 + $0xa0] ss:$8 sps:$4 sm:$0xff]  }
  0x62   :  { %417 = vmatprep.subr.bf16.mxu0 %v4130_v7  ;;  %503 = vmatpush1.bf16.msra.mxu1 %v4135_v9  ;;  %v4149_v23 = vld [vmem:[#allocation6 + $0x80] ss:$8 sps:$4 sm:$0xff]   ;;  %v4160_v24 = vld [vmem:[#allocation6 + $0xb4] ss:$8 sps:$4 sm:$0xff]   ;;  %v4157_v25 = vld [vmem:[#allocation6 + $0xc4] ss:$8 sps:$4 sm:$0xff]  }
  0x63   :  { %504 = vmatprep.subr.bf16.mxu1 %v4140_v13  ;;  %v4158_v26 = vld [vmem:[#allocation6 + $0xb0] ss:$8 sps:$4 sm:$0xff]   ;;  %v4155_v27 = vld [vmem:[#allocation6 + $0xc0] ss:$8 sps:$4 sm:$0xff]   ;;  %v4166_v28 = vld [vmem:[#allocation6 + $0xf4] ss:$8 sps:$4 sm:$0xff]  }
  0x64   :  { %v4163_v29 = vld [vmem:[#allocation6 + $0xd4] ss:$8 sps:$4 sm:$0xff]   ;;  %v4164_v30 = vld [vmem:[#allocation6 + $0xf0] ss:$8 sps:$4 sm:$0xff]   ;;  %v4172_v32 = vld [vmem:[#allocation6 + $0x104] ss:$8 sps:$4 sm:$0xff]  }
  0x65   :  { %418 = vmatpush1.bf16.msra.mxu0 %v4132_v10  ;;  %v4161_v31 = vld [vmem:[#allocation6 + $0xd0] ss:$8 sps:$4 sm:$0xff]   ;;  %v4169_v33 = vld [vmem:[#allocation6 + $0xe4] ss:$8 sps:$4 sm:$0xff]   ;;  %v4170_v34 = vld [vmem:[#allocation6 + $0x100] ss:$8 sps:$4 sm:$0xff]  }
  0x66   :  { %587 = vmatprep.subr.bf16.mxu0 %v4139_v12  ;;  %505 = vmatpush1.bf16.msra.mxu1 %v4142_v14  ;;  %v4167_v35 = vld [vmem:[#allocation6 + $0xe0] ss:$8 sps:$4 sm:$0xff]   ;;  %v4175_v36 = vld [vmem:[#allocation6 + $0x114] ss:$8 sps:$4 sm:$0xff]   ;;  %v4178_v37 = vld [vmem:[#allocation6 + $0x124] ss:$8 sps:$4 sm:$0xff]  }
  0x67   :  { %674 = vmatprep.subr.bf16.mxu1 %v4148_v17  ;;  %v4173_v38 = vld [vmem:[#allocation6 + $0x110] ss:$8 sps:$4 sm:$0xff]   ;;  %v4176_v39 = vld [vmem:[#allocation6 + $0x120] ss:$8 sps:$4 sm:$0xff]   ;;  %v4187_v40 = vld [vmem:[#allocation6 + $0x154] ss:$8 sps:$4 sm:$0xff]  }
  0x68   :  { %3402 = vmatmul.mubr.msk.bf16.vlgmr.msra.gmra.mrb[0].mxu0 %vm409_vm0, %v4642_v11  ;;  %v4181_v41 = vld [vmem:[#allocation6 + $0x134] ss:$8 sps:$4 sm:$0xff]   ;;  %v4179_v42 = vld [vmem:[#allocation6 + $0x130] ss:$8 sps:$4 sm:$0xff]   ;;  %v4190_v44 = vld [vmem:[#allocation6 + $0x164] ss:$8 sps:$4 sm:$0xff]  }
  0x69   :  { %588 = vmatpush1.bf16.msra.mxu0 %v4137_v15  ;;  %619 = vmatprep.mubr.bf16.mxu0 %v4507_v0  ;;  %v4185_v43 = vld [vmem:[#allocation6 + $0x150] ss:$8 sps:$4 sm:$0xff]   ;;  %v4184_v45 = vld [vmem:[#allocation6 + $0x144] ss:$8 sps:$4 sm:$0xff]   ;;  %v4182_v46 = vld [vmem:[#allocation6 + $0x140] ss:$8 sps:$4 sm:$0xff]  }
  0x6a   :  { %589 = vmatprep.subr.bf16.mxu0 %v4145_v16  ;;  %3409 = vmatmul.mubr.msk.bf16.vlgmr.msra.gmra.mrb[0].mxu1 %vm409_vm0, %v4642_v11  ;;  %v4188_v47 = vld [vmem:[#allocation6 + $0x160] ss:$8 sps:$4 sm:$0xff]   ;;  %v4193_v48 = vld [vmem:[#allocation6 + $0x174] ss:$8 sps:$4 sm:$0xff]   ;;  %v4191_v49 = vld [vmem:[#allocation6 + $0x170] ss:$8 sps:$4 sm:$0xff]  }
  0x6b   :  { %675 = vmatpush1.bf16.msra.mxu1 %v4146_v18  ;;  %706 = vmatprep.mubr.bf16.mxu1 %v4507_v0  ;;  %v4194_v50 = vld [vmem:[#allocation8 + $0xc0] sm:$0xff]   ;;  %v4196_v52 = vld [vmem:[#allocation8 + $0xc8] sm:$0xff]   ;;  %v4198_v54 = vld [vmem:[#allocation8 + $0xd0] sm:$0xff]  }
  0x6c   :  { %676 = vmatprep.subr.bf16.mxu1 %v4154_v20  ;;  %v4195_v51 = vld [vmem:[#allocation8 + $0x80] sm:$0xff]   ;;  %v4197_v53 = vld [vmem:[#allocation8 + $0x88] sm:$0xff]   ;;  %v4199_v55 = vld [vmem:[#allocation8 + $0x90] sm:$0xff]  }
  0x6d   :  { %590 = vmatpush1.bf16.msra.mxu0 %v4143_v19  ;;  %v4200_v56 = vld [vmem:[#allocation8 + $0xd8] sm:$0xff]   ;;  %v4202_v58 = vld [vmem:[#allocation8 + $0xe0] sm:$0xff]   ;;  %v4204_v60 = vld [vmem:[#allocation8 + $0xe8] sm:$0xff]  }
  0x6e   :  { %591 = vmatprep.subr.bf16.mxu0 %v4151_v21  ;;  %v4201_v57 = vld [vmem:[#allocation8 + $0x98] sm:$0xff]   ;;  %v4203_v59 = vld [vmem:[#allocation8 + $0xa0] sm:$0xff]   ;;  %v4205_v61 = vld [vmem:[#allocation8 + $0xa8] sm:$0xff]  }
  0x6f   :  { %677 = vmatpush1.bf16.msra.mxu1 %v4152_v22  ;;  %v4206_v62 = vld [vmem:[#allocation8 + $0xf0] sm:$0xff]   ;;  %v4208_v1 = vld [vmem:[#allocation8 + $0xf8] sm:$0xff]   ;;  %v4210_v3 = vld [vmem:[#allocation8 + $0x140] sm:$0xff]  }
  0x70   :  { %678 = vmatprep.subr.bf16.mxu1 %v4160_v24  ;;  %v4207_v63 = vld [vmem:[#allocation8 + $0xb0] sm:$0xff]   ;;  %v4209_v2 = vld [vmem:[#allocation8 + $0xb8] sm:$0xff]   ;;  %v4222_v4 = vld [vmem:[#allocation8 + $0x40] sm:$0xff]  }
  0x71   :  { %592 = vmatpush1.bf16.msra.mxu0 %v4149_v23  ;;  %v4211_v13 = vld [vmem:[#allocation8 + $0x100] sm:$0xff]   ;;  %v4212_v15 = vld [vmem:[#allocation8 + $0x148] sm:$0xff]   ;;  %v4214_v20 = vld [vmem:[#allocation8 + $0x150] sm:$0xff]  }
  0x72   :  { %761 = vmatprep.subr.bf16.mxu0 %v4157_v25  ;;  %v4213_v19 = vld [vmem:[#allocation8 + $0x108] sm:$0xff]   ;;  %v4215_v22 = vld [vmem:[#allocation8 + $0x110] sm:$0xff]   ;;  %v4216_v24 = vld [vmem:[#allocation8 + $0x158] sm:$0xff]  }
  0x73   :  { %679 = vmatpush1.bf16.msra.mxu1 %v4158_v26 }
  0x74   :  { %3416 = vmatmul.mubr.msk.bf16.vlgmr.msra.gmra.mrb[4].mxu0 %vm409_vm0, %v4642_v11  ;;  %848 = vmatprep.subr.bf16.mxu1 %v4166_v28 }
  0x75   :  { %762 = vmatpush1.bf16.msra.mxu0 %v4155_v27  ;;  %793 = vmatprep.mubr.bf16.mxu0 %v4507_v0 }
  0x76   :  { %763 = vmatprep.subr.bf16.mxu0 %v4163_v29  ;;  %3423 = vmatmul.mubr.msk.bf16.vlgmr.msra.gmra.mrb[4].mxu1 %vm409_vm0, %v4642_v11 }
  0x77   :  { %849 = vmatpush1.bf16.msra.mxu1 %v4164_v30  ;;  %880 = vmatprep.mubr.bf16.mxu1 %v4507_v0 }
  0x78   :  { %850 = vmatprep.subr.bf16.mxu1 %v4172_v32 }
  0x79   :  { %764 = vmatpush1.bf16.msra.mxu0 %v4161_v31  ;;  %v4217_v31 = vld [vmem:[#allocation8 + $0x118] sm:$0xff]  }
  0x7a   :  { %765 = vmatprep.subr.bf16.mxu0 %v4169_v33  ;;  %v4218_v33 = vld [vmem:[#allocation8 + $0x160] sm:$0xff]  }
  0x7b   :  { %851 = vmatpush1.bf16.msra.mxu1 %v4170_v34 }
  0x7c   :  { %852 = vmatprep.subr.bf16.mxu1 %v4175_v36 }
  0x7d   :  { %766 = vmatpush1.bf16.msra.mxu0 %v4167_v35 }
  0x7e   :  { %935 = vmatprep.subr.bf16.mxu0 %v4178_v37  ;;  %v4219_v37 = vld [vmem:[#allocation8 + $0x120] sm:$0xff]  }
  0x7f   :  { %853 = vmatpush1.bf16.msra.mxu1 %v4173_v38  ;;  %v4220_v38 = vld [vmem:[#allocation8 + $0x168] sm:$0xff]  }
  0x80   :  { %3430 = vmatmul.mubr.msk.bf16.vlgmr.msra.gmra.mrb[8].mxu0 %vm409_vm0, %v4642_v11  ;;  %1022 = vmatprep.subr.bf16.mxu1 %v4187_v40  ;;  %v4221_v40 = vld [vmem:[#allocation8 + $0x128] sm:$0xff]  }
  0x81   :  { %936 = vmatpush1.bf16.msra.mxu0 %v4176_v39  ;;  %967 = vmatprep.mubr.bf16.mxu0 %v4507_v0 }
  0x82   :  { %937 = vmatprep.subr.bf16.mxu0 %v4181_v41  ;;  %3437 = vmatmul.mubr.msk.bf16.vlgmr.msra.gmra.mrb[8].mxu1 %vm409_vm0, %v4642_v11 }
  0x83   :  { %1023 = vmatpush1.bf16.msra.mxu1 %v4185_v43  ;;  %1054 = vmatprep.mubr.bf16.mxu1 %v4507_v0 }
  0x84   :  { %1024 = vmatprep.subr.bf16.mxu1 %v4190_v44 }
  0x85   :  { %938 = vmatpush1.bf16.msra.mxu0 %v4179_v42  ;;  %v4224_v42 = vld [vmem:[#allocation8 + $0x170] sm:$0xff]  }
  0x86   :  { %939 = vmatprep.subr.bf16.mxu0 %v4184_v45 }
  0x87   :  { %1025 = vmatpush1.bf16.msra.mxu1 %v4188_v47 }
  0x88   :  { %1026 = vmatprep.subr.bf16.mxu1 %v4193_v48 }
  0x89   :  { %940 = vmatpush1.bf16.msra.mxu0 %v4182_v46 }
  0x8a   :  { %3549 = vmatprep.subr.bf16.mxu0 %v4194_v50 }
  0x8b   :  { %1027 = vmatpush1.bf16.msra.mxu1 %v4191_v49  ;;  %v4223_v49 = vld [vmem:[#allocation8] sm:$0xff]  }
  0x8c   :  { %3444 = vmatmul.mubr.msk.bf16.vlgmr.msra.gmra.mrb[12].mxu0 %vm409_vm0, %v4642_v11  ;;  %4029 = vmatprep.subr.bf16.mxu1 %v4194_v50  ;;  %v4225_v50 = vld [vmem:[#allocation8 + $0x130] sm:$0xff]  }
  0x8d   :  { %3550 = vmatpush3.bf16.msra.mxu0 %v4195_v51 }
  0x8e   :  { %3551 = vmatprep.subr.bf16.mxu0 %v4196_v52  ;;  %3451 = vmatmul.mubr.msk.bf16.vlgmr.msra.gmra.mrb[12].mxu1 %vm409_vm0, %v4642_v11 }
  0x8f   :  { %4037 = vmatpush3.bf16.msra.mxu1 %v4195_v51 }
  0x90   :  { %4030 = vmatprep.subr.bf16.mxu1 %v4196_v52  ;;  %v4226_v52 = vld [vmem:[#allocation8 + $0x48] sm:$0xff]  }
  0x91   :  { %3552 = vmatpush3.bf16.msra.mxu0 %v4197_v53 }
  0x92   :  { %3553 = vmatprep.subr.bf16.mxu0 %v4198_v54 }
  0x93   :  { %4038 = vmatpush3.bf16.msra.mxu1 %v4197_v53 }
  0x94   :  { %4031 = vmatprep.subr.bf16.mxu1 %v4198_v54 }
  0x95   :  { %3554 = vmatpush3.bf16.msra.mxu0 %v4199_v55 }
  0x96   :  { %3555 = vmatprep.subr.bf16.mxu0 %v4200_v56 }
  0x97   :  { %4039 = vmatpush3.bf16.msra.mxu1 %v4199_v55  ;;  %v4228_v55 = vld [vmem:[#allocation8 + $0x178] sm:$0xff]  }
  0x98   :  { %4032 = vmatprep.subr.bf16.mxu1 %v4200_v56 }
  0x99   :  { %3556 = vmatpush3.bf16.msra.mxu0 %v4201_v57 }
  0x9a   :  { %3557 = vmatprep.subr.bf16.mxu0 %v4202_v58 }
  0x9b   :  { %4040 = vmatpush3.bf16.msra.mxu1 %v4201_v57  ;;  %v4227_v57 = vld [vmem:[#allocation8 + $0x8] sm:$0xff]  }
  0x9c   :  { %4033 = vmatprep.subr.bf16.mxu1 %v4202_v58  ;;  %v4229_v58 = vld [vmem:[#allocation8 + $0x138] sm:$0xff]  }
  0x9d   :  { %3558 = vmatpush3.bf16.msra.mxu0 %v4203_v59 }
  0x9e   :  { %3559 = vmatprep.subr.bf16.mxu0 %v4204_v60 }
  0x9f   :  { %4041 = vmatpush3.bf16.msra.mxu1 %v4203_v59  ;;  %v4230_v59 = vld [vmem:[#allocation8 + $0x50] sm:$0xff]  }
  0xa0   :  { %4034 = vmatprep.subr.bf16.mxu1 %v4204_v60 }
  0xa1   :  { %3560 = vmatpush3.bf16.msra.mxu0 %v4205_v61 }
  0xa2   :  { %3561 = vmatprep.subr.bf16.mxu0 %v4206_v62 }
  0xa3   :  { %4042 = vmatpush3.bf16.msra.mxu1 %v4205_v61  ;;  %v4231_v61 = vld [vmem:[#allocation8 + $0x10] sm:$0xff]  }
  0xa4   :  { %4035 = vmatprep.subr.bf16.mxu1 %v4206_v62 }
  0xa5   :  { %3562 = vmatpush3.bf16.msra.mxu0 %v4207_v63 }
  0xa6   :  { %3563 = vmatprep.subr.bf16.mxu0 %v4208_v1 }
  0xa7   :  { %4043 = vmatpush3.bf16.msra.mxu1 %v4207_v63  ;;  %v4232_v63 = vld [vmem:[#allocation8 + $0x58] sm:$0xff]  }
  0xa8   :  { %4036 = vmatprep.subr.bf16.mxu1 %v4208_v1 }
  0xa9   :  { %3564 = vmatpush3.bf16.msra.mxu0 %v4209_v2 }
  0xaa   :  { %3677 = vmatprep.subr.bf16.mxu0 %v4210_v3 }
  0xab   :  { %4044 = vmatpush3.bf16.msra.mxu1 %v4209_v2 }
  0xac   :  { %3613 = vmatprep.subr.bf16.mxu1 %v4222_v4 }
 0x13b   :  { %v447_v5 = vpop.f32.mrb[0].mxu0 }
 0x13c   :  { %v449_v6 = vpop.f32.mrb[1].mxu0 }
 0x13d   :  { %v451_v7 = vpop.f32.mrb[2].mxu0  ;;  %v534_v10 = vpop.f32.mrb[0].mxu1 }
 0x13e   :  { %v4666_v8 = vpack.c.bf16 %v451_v7, %v447_v5  ;;  %v453_v9 = vpop.f32.mrb[3].mxu0  ;;  %v536_v12 = vpop.f32.mrb[1].mxu1 }
 0x13f   :  { %v4668_v11 = vpack.c.bf16 %v453_v9, %v449_v6  ;;  %v538_v14 = vpop.f32.mrb[2].mxu1  ;;  %v4233_v6 = vld [vmem:[#allocation8 + $0x18] sm:$0xff]   ;;  %v4234_v9 = vld [vmem:[#allocation8 + $0x60] sm:$0xff]  }
 0x140   :  { %v4671_v16 = vpack.c.bf16 %v538_v14, %v534_v10  ;;  %v540_v17 = vpop.f32.mrb[3].mxu1 }
 0x141   :  { %1299 = vmatprep.mubr.bf16.mxu0 %v4668_v11  ;;  %v4674_v18 = vpack.c.bf16 %v540_v17, %v536_v12  ;;  %v4236_v17 = vld [vmem:[#allocation8 + $0x68] sm:$0xff]  }
 0x142   :  { %1300 = vmatmul.mubr.bf16.vlgmr.msra.gmra.mrb[16].mxu0 %v4666_v8 }
 0x143   :  { %3678 = vmatpush3.bf16.msra.mxu0 %v4211_v13  ;;  %1307 = vmatprep.mubr.bf16.mxu0 %v4674_v18 }
 0x144   :  { %3679 = vmatprep.subr.bf16.mxu0 %v4212_v15  ;;  %v4235_v15 = vld [vmem:[#allocation8 + $0x20] sm:$0xff]  }
 0x147   :  { %v621_v21 = vpop.f32.mrb[4].mxu0  ;;  %3680 = vmatpush3.bf16.msra.mxu0 %v4213_v19  ;;  %v4237_v19 = vld [vmem:[#allocation8 + $0x28] sm:$0xff]  }
 0x148   :  { %v623_v23 = vpop.f32.mrb[5].mxu0  ;;  %3681 = vmatprep.subr.bf16.mxu0 %v4214_v20  ;;  %v4238_v20 = vld [vmem:[#allocation8 + $0x70] sm:$0xff]  }
 0x149   :  { %v625_v25 = vpop.f32.mrb[6].mxu0  ;;  %v708_v28 = vpop.f32.mrb[4].mxu1 }
 0x14a   :  { %v4677_v26 = vpack.c.bf16 %v625_v25, %v621_v21  ;;  %v627_v27 = vpop.f32.mrb[7].mxu0  ;;  %1308 = vmatmul.mubr.bf16.gmra.mrb[20].mxu0 %v4671_v16  ;;  %v710_v30 = vpop.f32.mrb[5].mxu1  ;;  %v4239_v21 = vld [vmem:[#allocation8 + $0x30] sm:$0xff]  }
 0x14b   :  { %v4680_v29 = vpack.c.bf16 %v627_v27, %v623_v23  ;;  %3682 = vmatpush3.bf16.msra.mxu0 %v4215_v22  ;;  %v712_v32 = vpop.f32.mrb[6].mxu1  ;;  %v4240_v22 = vld [vmem:[#allocation8 + $0x78] sm:$0xff]  }
 0x14c   :  { %3683 = vmatprep.subr.bf16.mxu0 %v4216_v24  ;;  %v4683_v34 = vpack.c.bf16 %v712_v32, %v708_v28  ;;  %v714_v35 = vpop.f32.mrb[7].mxu1  ;;  %v4241_v23 = vld [vmem:[#allocation8 + $0x38] sm:$0xff]  }
 0x14d   :  { %1315 = vmatprep.mubr.bf16.mxu0 %v4680_v29  ;;  %v4685_v36 = vpack.c.bf16 %v714_v35, %v710_v30  ;;  %v4243_v35 = vld [vmem:[#allocation9 + $0x48] sm:$0xff]  }
 0x14f   :  { %3684 = vmatpush3.bf16.msra.mxu0 %v4217_v31 }
 0x150   :  { %3685 = vmatprep.subr.bf16.mxu0 %v4218_v33 }
 0x152   :  { %1316 = vmatmul.mubr.bf16.gmra.mrb[24].mxu0 %v4677_v26 }
 0x153   :  { %v795_v39 = vpop.f32.mrb[8].mxu0  ;;  %1323 = vmatprep.mubr.bf16.mxu0 %v4685_v36  ;;  %3686 = vmatpush3.bf16.msra.mxu0 %v4219_v37 }
 0x154   :  { %v797_v41 = vpop.f32.mrb[9].mxu0  ;;  %3687 = vmatprep.subr.bf16.mxu0 %v4220_v38 }
 0x155   :  { %v799_v43 = vpop.f32.mrb[10].mxu0  ;;  %v882_v46 = vpop.f32.mrb[8].mxu1 }
 0x156   :  { %v4689_v44 = vpack.c.bf16 %v799_v43, %v795_v39  ;;  %v801_v45 = vpop.f32.mrb[11].mxu0  ;;  %v884_v48 = vpop.f32.mrb[9].mxu1 }
 0x157   :  { %v4691_v47 = vpack.c.bf16 %v801_v45, %v797_v41  ;;  %3688 = vmatpush3.bf16.msra.mxu0 %v4221_v40  ;;  %v886_v51 = vpop.f32.mrb[10].mxu1  ;;  %v4244_v40 = vld [vmem:[#allocation9 + $0x50] sm:$0xff]   ;;  %v4245_v45 = vld [vmem:[#allocation9 + $0x58] sm:$0xff]  }
 0x158   :  { %3689 = vmatprep.subr.bf16.mxu0 %v4224_v42  ;;  %v4694_v53 = vpack.c.bf16 %v886_v51, %v882_v46  ;;  %v888_v54 = vpop.f32.mrb[11].mxu1 }
 0x159   :  { %1331 = vmatprep.mubr.bf16.mxu1 %v4691_v47  ;;  %v4698_v56 = vpack.c.bf16 %v888_v54, %v884_v48  ;;  %v4246_v54 = vld [vmem:[#allocation9 + $0x60] sm:$0xff]  }
 0x15a   :  { %1324 = vmatmul.mubr.bf16.gmra.mrb[28].mxu0 %v4683_v34  ;;  %1332 = vmatmul.mubr.bf16.vlgmr.msra.gmra.mrb[16].mxu1 %v4689_v44 }
 0x15b   :  { %3614 = vmatpush3.bf16.msra.mxu1 %v4223_v49  ;;  %3690 = vmatpush3.bf16.msra.mxu0 %v4225_v50 }
 0x15c   :  { %1718 = vmatprep.mubr.bf16.mxu0 %v4674_v18  ;;  %3615 = vmatprep.subr.bf16.mxu1 %v4226_v52 }
 0x15d   :  { %1339 = vmatprep.mubr.bf16.mxu1 %v4698_v56  ;;  %3691 = vmatprep.subr.bf16.mxu0 %v4228_v55 }
 0x15f   :  { %3616 = vmatpush3.bf16.msra.mxu1 %v4227_v57  ;;  %3692 = vmatpush3.bf16.msra.mxu0 %v4229_v58  ;;  %v969_v60 = vpop.f32.mrb[12].mxu0 }
 0x160   :  { %v971_v62 = vpop.f32.mrb[13].mxu0  ;;  %3617 = vmatprep.subr.bf16.mxu1 %v4230_v59  ;;  %v4247_v59 = vld [vmem:[#allocation9 + $0x68] sm:$0xff]  }
 0x161   :  { %v973_v1 = vpop.f32.mrb[14].mxu0  ;;  %v1056_v4 = vpop.f32.mrb[12].mxu1 }
 0x162   :  { %v4702_v2 = vpack.c.bf16 %v973_v1, %v969_v60  ;;  %1340 = vmatmul.mubr.bf16.gmra.mrb[20].mxu1 %v4694_v53  ;;  %1719 = vmatmul.mubr.bf16.vlgmr.msra.gmra.mrb[32].mxu0 %v4671_v16  ;;  %v975_v3 = vpop.f32.mrb[15].mxu0  ;;  %v1058_v7 = vpop.f32.mrb[13].mxu1 }
 0x163   :  { %3618 = vmatpush3.bf16.msra.mxu1 %v4231_v61  ;;  %v979_v5 = vpack.c.bf16 %v975_v3, %v971_v62  ;;  %1726 = vmatprep.mubr.bf16.mxu0 %v4680_v29  ;;  %v1060_v10 = vpop.f32.mrb[14].mxu1  ;;  %v4248_v3 = vld [vmem:[#allocation9 + $0x70] sm:$0xff]  }
 0x164   :  { %3619 = vmatprep.subr.bf16.mxu1 %v4232_v63  ;;  %v1065_v12 = vpack.c.bf16 %v1060_v10, %v1056_v4  ;;  %v1062_v13 = vpop.f32.mrb[15].mxu1 }
 0x165   :  { %1347 = vmatprep.mubr.bf16.mxu1 %v979_v5  ;;  %v1066_v14 = vpack.c.bf16 %v1062_v13, %v1058_v7 }
 0x167   :  { %3620 = vmatpush3.bf16.msra.mxu1 %v4233_v6  ;;  %v4249_v6 = vld [vmem:[#allocation9 + $0x78] sm:$0xff]  }
 0x168   :  { %3621 = vmatprep.subr.bf16.mxu1 %v4234_v9 }
 0x16a   :  { %1348 = vmatmul.mubr.bf16.gmra.mrb[24].mxu1 %v4702_v2  ;;  %1727 = vmatmul.mubr.bf16.gmra.mrb[36].mxu0 %v4677_v26 }
 0x16b   :  { %3622 = vmatpush3.bf16.msra.mxu1 %v4235_v15  ;;  %1734 = vmatprep.mubr.bf16.mxu0 %v4685_v36 }
 0x16c   :  { %3623 = vmatprep.subr.bf16.mxu1 %v4236_v17  ;;  %1355 = vmatprep.mubr.bf16.mxu1 %v1066_v14 }
 0x16f   :  { %3624 = vmatpush3.bf16.msra.mxu1 %v4237_v19 }
 0x170   :  { %3625 = vmatprep.subr.bf16.mxu1 %v4238_v20 }
 0x172   :  { %1356 = vmatmul.mubr.bf16.gmra.mrb[28].mxu1 %v1065_v12  ;;  %1735 = vmatmul.mubr.bf16.gmra.mrb[40].mxu0 %v4683_v34 }
 0x173   :  { %3626 = vmatpush3.bf16.msra.mxu1 %v4239_v21  ;;  %1742 = vmatprep.mubr.bf16.mxu0 %v4691_v47 }
 0x174   :  { %3627 = vmatprep.subr.bf16.mxu1 %v4240_v22  ;;  %1492 = vmatprep.mubr.bf16.mxu1 %v4507_v0 }
 0x177   :  { %3628 = vmatpush3.bf16.msra.mxu1 %v4241_v23  ;;  %v4761_v23 = vld [vmem:[#allocation9] sm:$0xff]  }
 0x17a   :  { %1493 = vmatmul.mubr.bf16.vlgmr.msra.gmra.mrb[32].mxu1 %v4507_v0  ;;  %1743 = vmatmul.mubr.bf16.gmra.mrb[44].mxu0 %v4689_v44 }
 0x17b   :  { %1500 = vmatprep.mubr.bf16.mxu1 %v4668_v11  ;;  %1750 = vmatprep.mubr.bf16.mxu0 %v4698_v56 }
 0x182   :  { %1501 = vmatmul.mubr.bf16.gmra.mrb[36].mxu1 %v4666_v8  ;;  %1751 = vmatmul.mubr.bf16.gmra.mrb[48].mxu0 %v4694_v53  ;;  %v4242_v8 = vld [vmem:[#allocation9 + $0x40] sm:$0xff]  }
 0x183   :  { %1508 = vmatprep.mubr.bf16.mxu1 %v4674_v18  ;;  %1758 = vmatprep.mubr.bf16.mxu0 %v979_v5 }
 0x184   :  { %3837 = vmatprep.subr.bf16.mxu1 %v4242_v8 }
 0x185   :  { %3838 = vmatpush3.bf16.msra.mxu1 %v4242_v8 }
 0x186   :  { %3839 = vmatprep.subr.bf16.mxu1 %v4243_v35 }
 0x189   :  { %3840 = vmatpush3.bf16.msra.mxu1 %v4243_v35 }
 0x18a   :  { %1509 = vmatmul.mubr.bf16.gmra.mrb[40].mxu1 %v4671_v16  ;;  %1759 = vmatmul.mubr.bf16.gmra.mrb[52].mxu0 %v4702_v2 }
 0x18b   :  { %1516 = vmatprep.mubr.bf16.mxu1 %v4680_v29  ;;  %1766 = vmatprep.mubr.bf16.mxu0 %v1066_v14 }
 0x18c   :  { %3841 = vmatprep.subr.bf16.mxu1 %v4244_v40 }
 0x18d   :  { %3842 = vmatpush3.bf16.msra.mxu1 %v4244_v40 }
 0x18e   :  { %3843 = vmatprep.subr.bf16.mxu1 %v4245_v45 }
 0x191   :  { %3844 = vmatpush3.bf16.msra.mxu1 %v4245_v45 }
 0x192   :  { %1517 = vmatmul.mubr.bf16.gmra.mrb[44].mxu1 %v4677_v26  ;;  %1767 = vmatmul.mubr.bf16.gmra.mrb[56].mxu0 %v1065_v12 }
 0x193   :  { %1524 = vmatprep.mubr.bf16.mxu1 %v4685_v36  ;;  %1774 = vmatprep.mubr.bf16.mxu0 %v4507_v0 }
 0x194   :  { %3845 = vmatprep.subr.bf16.mxu1 %v4246_v54 }
 0x195   :  { %3846 = vmatpush3.bf16.msra.mxu1 %v4246_v54 }
 0x196   :  { %3847 = vmatprep.subr.bf16.mxu1 %v4247_v59 }
 0x199   :  { %3848 = vmatpush3.bf16.msra.mxu1 %v4247_v59 }
 0x19a   :  { %1525 = vmatmul.mubr.bf16.gmra.mrb[48].mxu1 %v4683_v34  ;;  %1775 = vmatmul.mubr.bf16.gmra.mrb[60].mxu0 %v4507_v0 }
 0x19b   :  { %1532 = vmatprep.mubr.bf16.mxu1 %v4691_v47  ;;  %3849 = vmatprep.subr.bf16.mxu1 %v4248_v3 }
 0x19d   :  { %3850 = vmatpush3.bf16.msra.mxu1 %v4248_v3 }
 0x19e   :  { %3851 = vmatprep.subr.bf16.mxu1 %v4249_v6 }
 0x1a1   :  { %3852 = vmatpush3.bf16.msra.mxu1 %v4249_v6 }
 0x1a2   :  { %1533 = vmatmul.mubr.bf16.gmra.mrb[52].mxu1 %v4689_v44  ;;  %3869 = vmatprep.subr.bf16.mxu1 %v4761_v23 }
 0x1a3   :  { %1540 = vmatprep.mubr.bf16.mxu1 %v4698_v56 }
 0x1aa   :  { %1541 = vmatmul.mubr.bf16.gmra.mrb[56].mxu1 %v4694_v53 }
 0x1ab   :  { %1548 = vmatprep.mubr.bf16.mxu1 %v979_v5 }
 0x1b2   :  { %1549 = vmatmul.mubr.bf16.gmra.mrb[60].mxu1 %v4702_v2 }
 0x215   :  { %v3565_v11 = vpop.f32.mrb[16].mxu0 }
 0x216   :  { %v3566_v16 = vpop.f32.mrb[17].mxu0 }
 0x217   :  { %v4733_v18 = vadd.f32 %v3566_v16, %v3565_v11  ;;  %v3568_v24 = vpop.f32.mrb[18].mxu0 }
 0x218   :  { %v3569_v25 = vpop.f32.mrb[19].mxu0 }
 0x219   :  { %v4735_v26 = vadd.f32 %v3569_v25, %v3568_v24 }
 0x21d   :  { %v3571_v27 = vpop.f32.mrb[20].mxu0 }
 0x21e   :  { %v3572_v28 = vpop.f32.mrb[21].mxu0 }
 0x21f   :  { %v4737_v29 = vadd.f32 %v3572_v28, %v3571_v27  ;;  %v3574_v30 = vpop.f32.mrb[22].mxu0 }
 0x220   :  { %v3575_v31 = vpop.f32.mrb[23].mxu0 }
 0x221   :  { %v4739_v32 = vadd.f32 %v3575_v31, %v3574_v30 }
 0x225   :  { %v3577_v33 = vpop.f32.mrb[24].mxu0 }
 0x226   :  { %v3578_v34 = vpop.f32.mrb[25].mxu0 }
 0x227   :  { %v4741_v36 = vadd.f32 %v3578_v34, %v3577_v33  ;;  %v3580_v37 = vpop.f32.mrb[26].mxu0 }
 0x228   :  { %v3581_v38 = vpop.f32.mrb[27].mxu0 }
 0x229   :  { %v4743_v39 = vadd.f32 %v3581_v38, %v3580_v37 }
 0x22d   :  { %v3583_v41 = vpop.f32.mrb[28].mxu0  ;;  %v3589_v42 = vpop.f32.mrb[16].mxu1 }
 0x22e   :  { %v3584_v43 = vpop.f32.mrb[29].mxu0  ;;  %v3590_v44 = vpop.f32.mrb[17].mxu1 }
 0x22f   :  { %v4745_v46 = vadd.f32 %v3584_v43, %v3583_v41  ;;  %v4747_v47 = vadd.f32 %v3590_v44, %v3589_v42  ;;  %v3586_v48 = vpop.f32.mrb[30].mxu0  ;;  %v3592_v49 = vpop.f32.mrb[18].mxu1 }
 0x230   :  { %v3587_v50 = vpop.f32.mrb[31].mxu0  ;;  %v3593_v51 = vpop.f32.mrb[19].mxu1 }
 0x231   :  { %v4749_v52 = vadd.f32 %v3587_v50, %v3586_v48  ;;  %v4751_v53 = vadd.f32 %v3593_v51, %v3592_v49 }
 0x235   :  { %v3595_v55 = vpop.f32.mrb[20].mxu1  ;;  %v3693_v56 = vpop.f32.mrb[32].mxu0 }
 0x236   :  { %v3596_v57 = vpop.f32.mrb[21].mxu1  ;;  %v3694_v58 = vpop.f32.mrb[33].mxu0 }
 0x237   :  { %v4753_v60 = vadd.f32 %v3596_v57, %v3595_v55  ;;  %v3695_v61 = vadd.f32 %v3694_v58, %v3693_v56  ;;  %v3598_v62 = vpop.f32.mrb[22].mxu1  ;;  %v3696_v63 = vpop.f32.mrb[34].mxu0 }
 0x238   :  { %v3599_v1 = vpop.f32.mrb[23].mxu1  ;;  %v3697_v2 = vpop.f32.mrb[35].mxu0 }
 0x239   :  { %v4755_v4 = vadd.f32 %v3599_v1, %v3598_v62  ;;  %v3698_v5 = vadd.f32 %v3697_v2, %v3696_v63 }
 0x23d   :  { %v3601_v7 = vpop.f32.mrb[24].mxu1  ;;  %v3699_v9 = vpop.f32.mrb[36].mxu0 }
 0x23e   :  { %v3602_v10 = vpop.f32.mrb[25].mxu1  ;;  %v3700_v12 = vpop.f32.mrb[37].mxu0 }
 0x23f   :  { %v4757_v13 = vadd.f32 %v3602_v10, %v3601_v7  ;;  %v3701_v14 = vadd.f32 %v3700_v12, %v3699_v9  ;;  %v3604_v15 = vpop.f32.mrb[26].mxu1  ;;  %v3702_v17 = vpop.f32.mrb[38].mxu0 }
 0x240   :  { %v3605_v19 = vpop.f32.mrb[27].mxu1  ;;  %v3703_v20 = vpop.f32.mrb[39].mxu0 }
 0x241   :  { %v4759_v21 = vadd.f32 %v3605_v19, %v3604_v15  ;;  %v3704_v22 = vadd.f32 %v3703_v20, %v3702_v17 }
 0x245   :  { %v3607_v8 = vpop.f32.mrb[28].mxu1  ;;  %v3705_v11 = vpop.f32.mrb[40].mxu0 }
 0x246   :  { %v3608_v16 = vpop.f32.mrb[29].mxu1  ;;  %v3706_v24 = vpop.f32.mrb[41].mxu0 }
 0x247   :  { %v4764_v25 = vadd.f32 %v3608_v16, %v3607_v8  ;;  %v3707_v27 = vadd.f32 %v3706_v24, %v3705_v11  ;;  %v3610_v28 = vpop.f32.mrb[30].mxu1  ;;  %v3708_v30 = vpop.f32.mrb[42].mxu0 }
 0x248   :  { %v3611_v31 = vpop.f32.mrb[31].mxu1  ;;  %v3709_v33 = vpop.f32.mrb[43].mxu0 }
 0x249   :  { %v4766_v34 = vadd.f32 %v3611_v31, %v3610_v28  ;;  %v3710_v35 = vadd.f32 %v3709_v33, %v3708_v30 }
 0x24d   :  { %v3629_v37 = vpop.f32.mrb[32].mxu1  ;;  %v3711_v38 = vpop.f32.mrb[44].mxu0 }
 0x24e   :  { %v3630_v40 = vpop.f32.mrb[33].mxu1  ;;  %v3712_v41 = vpop.f32.mrb[45].mxu0 }
 0x24f   :  { %v3631_v42 = vadd.f32 %v3630_v40, %v3629_v37  ;;  %v4768_v43 = vadd.f32 %v3712_v41, %v3711_v38  ;;  %v3632_v44 = vpop.f32.mrb[34].mxu1  ;;  %v3714_v45 = vpop.f32.mrb[46].mxu0 }
 0x250   :  { %v3633_v48 = vpop.f32.mrb[35].mxu1  ;;  %v3715_v49 = vpop.f32.mrb[47].mxu0 }
 0x251   :  { %v1495_v50 = vadd.f32 %v3631_v42, %v4733_v18  ;;  %v3634_v51 = vadd.f32 %v3633_v48, %v3632_v44  ;;  %v4771_v54 = vadd.f32 %v3715_v49, %v3714_v45 }
 0x253   :  { %v4773_v55 = vadd.f32 %v3695_v61, %v1495_v50  ;;  %v1498_v56 = vadd.f32 %v3634_v51, %v4735_v26 }
 0x255   :  { %v4776_v57 = vadd.f32 %v3698_v5, %v1498_v56  ;;  %v3635_v58 = vpop.f32.mrb[36].mxu1  ;;  %v3717_v59 = vpop.f32.mrb[48].mxu0 }
 0x256   :  { %v3636_v62 = vpop.f32.mrb[37].mxu1  ;;  %v3718_v63 = vpop.f32.mrb[49].mxu0 }
 0x257   :  { %v3637_v1 = vadd.f32 %v3636_v62, %v3635_v58  ;;  %v4778_v2 = vadd.f32 %v3718_v63, %v3717_v59  ;;  %v3638_v3 = vpop.f32.mrb[38].mxu1  ;;  %v3720_v6 = vpop.f32.mrb[50].mxu0  ;;  %v1824_v19 = vmul.f32 %v4776_v57, %v4776_v57  ;;  %v1801_v30 = vadd.f32 %v4776_v57, %v4773_v55 }
 0x258   :  { %v3639_v7 = vpop.f32.mrb[39].mxu1  ;;  %v3721_v18 = vpop.f32.mrb[51].mxu0 }
 0x259   :  { %v1503_v9 = vadd.f32 %v3637_v1, %v4737_v29  ;;  %v3640_v10 = vadd.f32 %v3639_v7, %v3638_v3  ;;  %v4781_v61 = vadd.f32 %v3721_v18, %v3720_v6  ;;  %v1823_v29 = vmul.f32 %v4773_v55, %v4773_v55 }
 0x25b   :  { %v4783_v12 = vadd.f32 %v3701_v14, %v1503_v9  ;;  %v1506_v26 = vadd.f32 %v3640_v10, %v4739_v32  ;;  %v1839_v38 = vadd.f32 %v1824_v19, %v1823_v29 }
 0x25d   :  { %v4786_v5 = vadd.f32 %v3704_v22, %v1506_v26  ;;  %v3641_v15 = vpop.f32.mrb[40].mxu1  ;;  %v3723_v17 = vpop.f32.mrb[52].mxu0  ;;  %v1825_v14 = vmul.f32 %v4783_v12, %v4783_v12  ;;  %v1802_v40 = vadd.f32 %v1801_v30, %v4783_v12 }
 0x25e   :  { %v3642_v20 = vpop.f32.mrb[41].mxu1  ;;  %v3724_v8 = vpop.f32.mrb[53].mxu0 }
 0x25f   :  { %v3643_v11 = vadd.f32 %v3642_v20, %v3641_v15  ;;  %v3644_v16 = vpop.f32.mrb[42].mxu1  ;;  %v3726_v24 = vpop.f32.mrb[54].mxu0  ;;  %v4794_v28 = vadd.f32 %v3724_v8, %v3723_v17  ;;  %v1840_v44 = vadd.f32 %v1839_v38, %v1825_v14  ;;  %v1826_v45 = vmul.f32 %v4786_v5, %v4786_v5 }
 0x260   :  { %v3645_v32 = vpop.f32.mrb[43].mxu1  ;;  %v3727_v22 = vpop.f32.mrb[55].mxu0  ;;  %v1803_v58 = vadd.f32 %v1802_v40, %v4786_v5 }
 0x261   :  { %v1511_v31 = vadd.f32 %v3643_v11, %v4741_v36  ;;  %v3646_v33 = vadd.f32 %v3645_v32, %v3644_v16  ;;  %v4799_v37 = vadd.f32 %v3727_v22, %v3726_v24  ;;  %v1841_v63 = vadd.f32 %v1840_v44, %v1826_v45 }
 0x263   :  { %v4802_v41 = vadd.f32 %v3707_v27, %v1511_v31  ;;  %v1514_v42 = vadd.f32 %v3646_v33, %v4743_v39 }
 0x265   :  { %v4807_v48 = vadd.f32 %v3710_v35, %v1514_v42  ;;  %v3647_v49 = vpop.f32.mrb[44].mxu1  ;;  %v3729_v50 = vpop.f32.mrb[56].mxu0  ;;  %v1827_v36 = vmul.f32 %v4802_v41, %v4802_v41  ;;  %v1804_v35 = vadd.f32 %v1803_v58, %v4802_v41 }
 0x266   :  { %v3648_v51 = vpop.f32.mrb[45].mxu1  ;;  %v3730_v56 = vpop.f32.mrb[57].mxu0 }
 0x267   :  { %v3649_v59 = vadd.f32 %v3648_v51, %v3647_v49  ;;  %v3650_v27 = vpop.f32.mrb[46].mxu1  ;;  %v3732_v62 = vpop.f32.mrb[58].mxu0  ;;  %v4812_v39 = vadd.f32 %v3730_v56, %v3729_v50  ;;  %v1842_v9 = vadd.f32 %v1841_v63, %v1827_v36  ;;  %v1828_v10 = vmul.f32 %v4807_v48, %v4807_v48 }
 0x268   :  { %v3651_v1 = vpop.f32.mrb[47].mxu1  ;;  %v3733_v3 = vpop.f32.mrb[59].mxu0  ;;  %v1805_v17 = vadd.f32 %v1804_v35, %v4807_v48 }
 0x269   :  { %v1519_v6 = vadd.f32 %v3649_v59, %v4745_v46  ;;  %v3652_v7 = vadd.f32 %v3651_v1, %v3650_v27  ;;  %v4816_v18 = vadd.f32 %v3733_v3, %v3732_v62  ;;  %v1843_v11 = vadd.f32 %v1842_v9, %v1828_v10 }
 0x26b   :  { %v4821_v26 = vadd.f32 %v4768_v43, %v1519_v6  ;;  %v1522_v15 = vadd.f32 %v3652_v7, %v4749_v52 }
 0x26d   :  { %v1829_v19 = vmul.f32 %v4821_v26, %v4821_v26  ;;  %v4828_v20 = vadd.f32 %v4771_v54, %v1522_v15  ;;  %v3653_v46 = vpop.f32.mrb[48].mxu1  ;;  %v3735_v8 = vpop.f32.mrb[60].mxu0  ;;  %v1806_v29 = vadd.f32 %v1805_v17, %v4821_v26 }
 0x26e   :  { %v3654_v16 = vpop.f32.mrb[49].mxu1  ;;  %v3736_v24 = vpop.f32.mrb[61].mxu0 }
 0x26f   :  { %v3655_v14 = vadd.f32 %v3654_v16, %v3653_v46  ;;  %v3656_v43 = vpop.f32.mrb[50].mxu1  ;;  %v3738_v32 = vpop.f32.mrb[62].mxu0  ;;  %v1844_v22 = vadd.f32 %v1843_v11, %v1829_v19  ;;  %v3737_v30 = vadd.f32 %v3736_v24, %v3735_v8  ;;  %v1830_v33 = vmul.f32 %v4828_v20, %v4828_v20 }
 0x270   :  { %v3657_v52 = vpop.f32.mrb[51].mxu1  ;;  %v3739_v31 = vpop.f32.mrb[63].mxu0  ;;  %v1807_v42 = vadd.f32 %v1806_v29, %v4828_v20 }
 0x271   :  { %v1527_v54 = vadd.f32 %v3655_v14, %v4747_v47  ;;  %v3658_v38 = vadd.f32 %v3657_v52, %v3656_v43  ;;  %v3740_v40 = vadd.f32 %v3739_v31, %v3738_v32  ;;  %v1845_v49 = vadd.f32 %v1844_v22, %v1830_v33 }
 0x273   :  { %v4836_v44 = vadd.f32 %v4778_v2, %v1527_v54  ;;  %v1530_v45 = vadd.f32 %v3658_v38, %v4751_v53 }
 0x275   :  { %v1808_v50 = vadd.f32 %v1807_v42, %v4836_v44  ;;  %v1831_v36 = vmul.f32 %v4836_v44, %v4836_v44  ;;  %v4843_v51 = vadd.f32 %v4781_v61, %v1530_v45  ;;  %v3659_v56 = vpop.f32.mrb[52].mxu1 }
 0x276   :  { %v3660_v47 = vpop.f32.mrb[53].mxu1 }
 0x277   :  { %v1846_v58 = vadd.f32 %v1845_v49, %v1831_v36  ;;  %v1809_v59 = vadd.f32 %v1808_v50, %v4843_v51  ;;  %v1832_v2 = vmul.f32 %v4843_v51, %v4843_v51  ;;  %v3661_v27 = vadd.f32 %v3660_v47, %v3659_v56  ;;  %v3662_v62 = vpop.f32.mrb[54].mxu1 }
 0x278   :  { %v3663_v53 = vpop.f32.mrb[55].mxu1 }
 0x279   :  { %v1847_v63 = vadd.f32 %v1846_v58, %v1832_v2  ;;  %v1535_v1 = vadd.f32 %v3661_v27, %v4753_v60  ;;  %v3664_v3 = vadd.f32 %v3663_v53, %v3662_v62 }
 0x27b   :  { %v4850_v35 = vadd.f32 %v4794_v28, %v1535_v1  ;;  %v1538_v61 = vadd.f32 %v3664_v3, %v4755_v4 }
 0x27d   :  { %v1810_v6 = vadd.f32 %v1809_v59, %v4850_v35  ;;  %v1833_v7 = vmul.f32 %v4850_v35, %v4850_v35  ;;  %v4857_v9 = vadd.f32 %v4799_v37, %v1538_v61  ;;  %v3665_v10 = vpop.f32.mrb[56].mxu1 }
 0x27e   :  { %v3666_v15 = vpop.f32.mrb[57].mxu1 }
 0x27f   :  { %v1848_v17 = vadd.f32 %v1847_v63, %v1833_v7  ;;  %v1811_v19 = vadd.f32 %v1810_v6, %v4857_v9  ;;  %v1834_v60 = vmul.f32 %v4857_v9, %v4857_v9  ;;  %v3667_v28 = vadd.f32 %v3666_v15, %v3665_v10  ;;  %v3668_v46 = vpop.f32.mrb[58].mxu1 }
 0x280   :  { %v3669_v8 = vpop.f32.mrb[59].mxu1 }
 0x281   :  { %v1849_v4 = vadd.f32 %v1848_v17, %v1834_v60  ;;  %v1543_v11 = vadd.f32 %v3667_v28, %v4757_v13  ;;  %v3670_v16 = vadd.f32 %v3669_v8, %v3668_v46  ;;  %v109_v17 = vlaneseq }
 0x283   :  { %v4864_v24 = vadd.f32 %v4812_v39, %v1543_v11  ;;  %v1546_v37 = vadd.f32 %v3670_v16, %v4759_v21  ;;  %v110_v28 = vshrl.u32 %v109_v17, 7 }
 0x285   :  { %v1812_v29 = vadd.f32 %v1811_v19, %v4864_v24  ;;  %v1835_v14 = vmul.f32 %v4864_v24, %v4864_v24  ;;  %v4871_v43 = vadd.f32 %v4816_v18, %v1546_v37  ;;  %v3671_v32 = vpop.f32.mrb[60].mxu1  ;;  %v112_v46 = vadd.s32 16, %v110_v28 }
 0x286   :  { %v3672_v22 = vpop.f32.mrb[61].mxu1  ;;  %v114_v8 = vadd.s32 32, %v110_v28  ;;  %v118_v11 = vadd.s32 64, %v110_v28  ;;  %v120_v16 = vadd.s32 80, %v110_v28  ;;  %v122_v37 = vadd.s32 96, %v110_v28 }
 0x287   :  { %v1850_v52 = vadd.f32 %v1849_v4, %v1835_v14  ;;  %v1813_v31 = vadd.f32 %v1812_v29, %v4871_v43  ;;  %v1836_v13 = vmul.f32 %v4871_v43, %v4871_v43  ;;  %v3673_v39 = vadd.f32 %v3672_v22, %v3671_v32  ;;  %v3674_v33 = vpop.f32.mrb[62].mxu1 }
 0x288   :  { %v3675_v54 = vpop.f32.mrb[63].mxu1  ;;  %v116_v4 = vadd.s32 48, %v110_v28  ;;  %v130_v29 = vand.u32 15, %v110_v28  ;;  %v144_v14 = vand.u32 15, %v112_v46  ;;  %v158_v32 = vand.u32 15, %v114_v8 }
 0x289   :  { %v1851_v21 = vadd.f32 %v1850_v52, %v1836_v13  ;;  %v1551_v38 = vadd.f32 %v3673_v39, %v4764_v25  ;;  %v3676_v42 = vadd.f32 %v3675_v54, %v3674_v33  ;;  %v186_v52 = vand.u32 15, %v118_v11  ;;  %v1799_v39 = vld [vmem:[%s5250_s3] sm:$0x1] }
 0x28a   :  { %v172_v22 = vand.u32 15, %v116_v4  ;;  %v214_v13 = vand.u32 15, %v122_v37  ;;  %v4891_v33 = vsub.s32 0, %v110_v28  ;;  %vm318_vm1 = vcmp.lt.s32.totalorder %v130_v29, 2 }
 0x28b   :  { %v4877_v45 = vadd.f32 %v3737_v30, %v1551_v38  ;;  %v1554_v18 = vadd.f32 %v3676_v42, %v4766_v34  ;;  %vm320_vm2 = vcmp.lt.s32.totalorder %v144_v14, 2  ;;  %vm322_vm3 = vcmp.lt.s32.totalorder %v158_v32, 2  ;;  %v1800_v42 = vld [vmem:[%s5251_s4] sm:$0x1] }
 0x28c   :  { %vm324_vm4 = vcmp.lt.s32.totalorder %v172_v22, 2  ;;  %vm326_vm5 = vcmp.lt.s32.totalorder %v186_v52, 2  ;;  %vm330_vm7 = vcmp.lt.s32.totalorder %v214_v13, 2 }
 0x28d   :  { %v1814_v49 = vadd.f32 %v1813_v31, %v4877_v45  ;;  %v1837_v50 = vmul.f32 %v4877_v45, %v4877_v45  ;;  %v4883_v36 = vadd.f32 %v3740_v40, %v1554_v18  ;;  %v200_v31 = vand.u32 15, %v120_v16 }
 0x28e   :  { %v4508_v18 = vmov 0.0  }
 0x28f   :  { %v1852_v56 = vadd.f32 %v1851_v21, %v1837_v50  ;;  %v1815_v47 = vadd.f32 %v1814_v49, %v4883_v36  ;;  %v1838_v58 = vmul.f32 %v4883_v36, %v4883_v36  ;;  %v124_v21 = vadd.s32 112, %v110_v28 }
 0x290   :  { %vm328_vm6 = vcmp.lt.s32.totalorder %v200_v31, 2  ;;  %v3387_v49 = vsel %vm318_vm1, 1.0, %v4508_v18  ;;  %v3388_v50 = vsel %vm320_vm2, 1.0, %v4508_v18 }
 0x291   :  { %v1816_v59 = vrot.slane %v1815_v47, 4  ;;  %v1853_v25 = vadd.f32 %v1852_v56, %v1838_v58  ;;  %v3389_v58 = vsel %vm322_vm3, 1.0, %v4508_v18 }
 0x293   :  { %v1817_v2 = vadd.f32 %v1816_v59, %v1815_v47  ;;  %v1854_v30 = vrot.slane %v1853_v25, 4  ;;  %v3390_v59 = vsel %vm324_vm4, 1.0, %v4508_v18 }
 0x295   :  { %v1818_v27 = vrot.slane %v1817_v2, 2  ;;  %v1855_v62 = vadd.f32 %v1854_v30, %v1853_v25  ;;  %v4904_v25 = vsel %vm326_vm5, 1.0, %v4508_v18  ;;  %v4910_v30 = vsel %vm330_vm7, 1.0, %v4508_v18 }
 0x297   :  { %v1819_v34 = vadd.f32 %v1818_v27, %v1817_v2  ;;  %v1856_v53 = vrot.slane %v1855_v62, 2  ;;  %v4907_v2 = vsel %vm328_vm6, 1.0, %v4508_v18  ;;  %v228_v27 = vand.u32 15, %v124_v21 }
 0x299   :  { %v1820_v63 = vrot.slane %v1819_v34, 1  ;;  %v1857_v1 = vadd.f32 %v1856_v53, %v1855_v62  ;;  %vm4951_vm8 = vcmp.lt.s32.totalorder %v228_v27, 2 }
 0x29b   :  { %v1821_v3 = vadd.f32 %v1820_v63, %v1819_v34  ;;  %v1858_v61 = vrot.slane %v1857_v1, 1 }
 0x29d   :  { %v1822_v40 = vmul.f32 0.0625, %v1821_v3  ;;  %v1859_v6 = vadd.f32 %v1858_v61, %v1857_v1 }
 0x29f   :  { %v1860_v7 = vmul.f32 0.0625, %v1859_v6  ;;  %v1861_v10 = vmul.f32 %v1822_v40, %v1822_v40 }
 0x2a1   :  { %v1862_v15 = vsub.f32 %v1860_v7, %v1861_v10 }
 0x2a3   :  { %v1863_v19 = vmax.f32 %v1862_v15, 0.0 }
 0x2a5   :  { %v1864_v60 = vadd.f32 1e-05, %v1863_v19 }
 0x2a7   :  { %4290 = vrsqrt.f32 %v1864_v60 }
 0x2b1   :  { %v4291_v54 = vpop.eup %4290 }
 0x2b2   :  { %v1866_v38 = vmul.f32 %v4291_v54, %v1799_v39 }
 0x2b4   :  { %v1867_v56 = vmul.f32 %v1866_v38, %v1822_v40  ;;  %v4899_v47 = vrot.slane %v1866_v38, %v4891_v33  ;;  %v4251_v38 = vld [vmem:[#allocation9 + $0x8] sm:$0xff]  }
 0x2b6   :  { %v1868_v62 = vsub.f32 %v1800_v42, %v1867_v56  ;;  %v1875_v34 = vmul.f32 %v4899_v47, %v4773_v55  ;;  %v1876_v53 = vmul.f32 %v4899_v47, %v4776_v57  ;;  %v1877_v63 = vmul.f32 %v4899_v47, %v4783_v12 }
 0x2b7   :  { %v1878_v1 = vmul.f32 %v4899_v47, %v4786_v5  ;;  %v1879_v3 = vmul.f32 %v4899_v47, %v4802_v41  ;;  %v1880_v61 = vmul.f32 %v4899_v47, %v4807_v48  ;;  %v1881_v40 = vmul.f32 %v4899_v47, %v4821_v26 }
 0x2b8   :  { %v4927_v55 = vrot.slane %v1868_v62, %v4891_v33  ;;  %v1882_v57 = vmul.f32 %v4899_v47, %v4828_v20  ;;  %v1883_v12 = vmul.f32 %v4899_v47, %v4836_v44  ;;  %v1884_v5 = vmul.f32 %v4899_v47, %v4843_v51 }
 0x2b9   :  { %v1885_v41 = vmul.f32 %v4899_v47, %v4850_v35  ;;  %v1886_v48 = vmul.f32 %v4899_v47, %v4857_v9  ;;  %v1887_v26 = vmul.f32 %v4899_v47, %v4864_v24  ;;  %v1888_v6 = vmul.f32 %v4899_v47, %v4871_v43  ;;  %v4261_v24 = vld [vmem:[#allocation9 + $0x98] sm:$0xff]  }
 0x2ba   :  { %v1897_v20 = vadd.f32 %v4927_v55, %v1875_v34  ;;  %v1898_v7 = vadd.f32 %v4927_v55, %v1876_v53  ;;  %v1899_v44 = vadd.f32 %v4927_v55, %v1877_v63  ;;  %v1900_v51 = vadd.f32 %v4927_v55, %v1878_v1 }
 0x2bb   :  { %v1901_v10 = vadd.f32 %v4927_v55, %v1879_v3  ;;  %v1902_v35 = vadd.f32 %v4927_v55, %v1880_v61  ;;  %v1903_v9 = vadd.f32 %v4927_v55, %v1881_v40  ;;  %v1904_v15 = vadd.f32 %v4927_v55, %v1882_v57  ;;  %v4252_v57 = vld [vmem:[#allocation9 + $0x10] sm:$0xff]  }
 0x2bc   :  { %v1913_v43 = vmax.f32 %v1897_v20, 0.0  ;;  %v1914_v17 = vmax.f32 %v1898_v7, 0.0  ;;  %v1915_v19 = vmax.f32 %v1899_v44, 0.0  ;;  %v1916_v60 = vmax.f32 %v1900_v51, 0.0  ;;  %v4253_v20 = vld [vmem:[#allocation9 + $0x18] sm:$0xff]   ;;  %v4256_v51 = vld [vmem:[#allocation9 + $0x30] sm:$0xff]  }
 0x2bd   :  { %v1917_v28 = vmax.f32 %v1901_v10, 0.0  ;;  %v1918_v46 = vmax.f32 %v1902_v35, 0.0  ;;  %v1919_v8 = vmax.f32 %v1903_v9, 0.0  ;;  %v1920_v4 = vmax.f32 %v1904_v15, 0.0  ;;  %v4257_v10 = vld [vmem:[#allocation9 + $0x38] sm:$0xff]   ;;  %v4258_v35 = vld [vmem:[#allocation9 + $0x80] sm:$0xff]  }
 0x2be   :  { %v1929_v11 = vmul.f32 %v3387_v49, %v1913_v43  ;;  %v1930_v16 = vmul.f32 0.0, %v1914_v17  ;;  %v1931_v37 = vmul.f32 %v3388_v50, %v1915_v19  ;;  %v1932_v29 = vmul.f32 0.0, %v1916_v60  ;;  %v4259_v9 = vld [vmem:[#allocation9 + $0x88] sm:$0xff]   ;;  %v4260_v15 = vld [vmem:[#allocation9 + $0x90] sm:$0xff]   ;;  %v4262_v43 = vld [vmem:[#allocation9 + $0xa0] sm:$0xff]  }
 0x2bf   :  { %v1933_v14 = vmul.f32 %v3389_v58, %v1917_v28  ;;  %v1934_v32 = vmul.f32 0.0, %v1918_v46  ;;  %v1935_v22 = vmul.f32 %v3390_v59, %v1919_v8  ;;  %v1936_v52 = vmul.f32 0.0, %v1920_v4  ;;  %v4263_v17 = vld [vmem:[#allocation9 + $0xa8] sm:$0xff]   ;;  %v4264_v19 = vld [vmem:[#allocation9 + $0xb0] sm:$0xff]   ;;  %v4265_v60 = vld [vmem:[#allocation9 + $0xb8] sm:$0xff]  }
 0x2c0   :  { %v4955_v31 = vpack.c.bf16 %v1930_v16, %v1929_v11  ;;  %v4957_v13 = vpack.c.bf16 %v1932_v29, %v1931_v37  ;;  %v1905_v39 = vadd.f32 %v4927_v55, %v1883_v12  ;;  %v1906_v54 = vadd.f32 %v4927_v55, %v1884_v5  ;;  %v4266_v28 = vld [vmem:[#allocation11 + $0x40] sm:$0xff]   ;;  %v4267_v46 = vld [vmem:[#allocation11 + $0x48] sm:$0xff]   ;;  %v4268_v8 = vld [vmem:[#allocation11 + $0x50] sm:$0xff]  }
 0x2c1   :  { %v4961_v21 = vpack.c.bf16 %v1934_v32, %v1933_v14  ;;  %v4963_v42 = vpack.c.bf16 %v1936_v52, %v1935_v22  ;;  %v1907_v49 = vadd.f32 %v4927_v55, %v1885_v41  ;;  %v1908_v50 = vadd.f32 %v4927_v55, %v1886_v48  ;;  %3933 = vmatprep.subr.bf16.mxu0 %v4266_v28  ;;  %v4269_v4 = vld [vmem:[#allocation11 + $0x58] sm:$0xff]   ;;  %v4270_v11 = vld [vmem:[#allocation11 + $0x60] sm:$0xff]   ;;  %v4271_v16 = vld [vmem:[#allocation11 + $0x68] sm:$0xff]  }
 0x2c2   :  { %3853 = vmatprep.mubr.bf16.mxu1 %v4955_v31  ;;  %v1921_v56 = vmax.f32 %v1905_v39, 0.0  ;;  %v1922_v58 = vmax.f32 %v1906_v54, 0.0  ;;  %v1909_v59 = vadd.f32 %v4927_v55, %v1887_v26  ;;  %v1910_v27 = vadd.f32 %v4927_v55, %v1888_v6  ;;  %3934 = vmatpush3.bf16.msra.mxu0 %v4266_v28  ;;  %v4272_v37 = vld [vmem:[#allocation11 + $0x70] sm:$0xff]   ;;  %v4273_v29 = vld [vmem:[#allocation11 + $0x78] sm:$0xff]   ;;  %v5005_v14 = vld [vmem:[#allocation11] sm:$0xff]  }
 0x2c3   :  { %3854 = vmatmul.mubr.bf16.vlgmr.msra.gmra.mrb[64].mxu1 %v4957_v13  ;;  %v1923_v62 = vmax.f32 %v1907_v49, 0.0  ;;  %v1924_v34 = vmax.f32 %v1908_v50, 0.0  ;;  %v1889_v53 = vmul.f32 %v4899_v47, %v4877_v45  ;;  %v1890_v63 = vmul.f32 %v4899_v47, %v4883_v36  ;;  %3935 = vmatprep.subr.bf16.mxu0 %v4267_v46 }
 0x2c4   :  { %3870 = vmatpush3.bf16.msra.mxu1 %v4761_v23  ;;  %3857 = vmatprep.mubr.bf16.mxu1 %v4961_v21  ;;  %v1937_v1 = vmul.f32 %v4904_v25, %v1921_v56  ;;  %v1938_v3 = vmul.f32 0.0, %v1922_v58  ;;  %v1925_v61 = vmax.f32 %v1909_v59, 0.0  ;;  %v1926_v40 = vmax.f32 %v1910_v27, 0.0 }
 0x2c5   :  { %3871 = vmatprep.subr.bf16.mxu1 %v4251_v38  ;;  %v1939_v12 = vmul.f32 %v4907_v2, %v1923_v62  ;;  %v1940_v5 = vmul.f32 0.0, %v1924_v34  ;;  %v1911_v41 = vadd.f32 %v4927_v55, %v1889_v53  ;;  %v1912_v45 = vadd.f32 %v4927_v55, %v1890_v63 }
 0x2c6   :  { %v4981_v48 = vpack.c.bf16 %v1938_v3, %v1937_v1  ;;  %v1941_v23 = vmul.f32 %v4910_v30, %v1925_v61  ;;  %v1942_v36 = vmul.f32 0.0, %v1926_v40  ;;  %v3394_v47 = vsel %vm4951_vm8, 1.0, %v4508_v18  ;;  %v4254_v30 = vld [vmem:[#allocation9 + $0x20] sm:$0xff]   ;;  %v4255_v18 = vld [vmem:[#allocation9 + $0x28] sm:$0xff]   ;;  %3936 = vmatpush3.bf16.msra.mxu0 %v4267_v46 }
 0x2c7   :  { %v4987_v25 = vpack.c.bf16 %v1940_v5, %v1939_v12  ;;  %v1927_v26 = vmax.f32 %v1911_v41, 0.0  ;;  %v1928_v6 = vmax.f32 %v1912_v45, 0.0  ;;  %3937 = vmatprep.subr.bf16.mxu0 %v4268_v8 }
 0x2c8   :  { %3872 = vmatpush3.bf16.msra.mxu1 %v4251_v38  ;;  %v1951_v2 = vpack.c.bf16 %v1942_v36, %v1941_v23 }
 0x2c9   :  { %3873 = vmatprep.subr.bf16.mxu1 %v4252_v57  ;;  %v1943_v7 = vmul.f32 %v3394_v47, %v1927_v26  ;;  %v1944_v44 = vmul.f32 0.0, %v1928_v6 }
 0x2ca   :  { %3938 = vmatpush3.bf16.msra.mxu0 %v4268_v8 }
 0x2cb   :  { %3858 = vmatmul.mubr.bf16.gmra.mrb[68].mxu1 %v4963_v42  ;;  %v1952_v55 = vpack.c.bf16 %v1944_v44, %v1943_v7  ;;  %3939 = vmatprep.subr.bf16.mxu0 %v4269_v4 }
 0x2cc   :  { %3874 = vmatpush3.bf16.msra.mxu1 %v4252_v57  ;;  %3861 = vmatprep.mubr.bf16.mxu1 %v4981_v48 }
 0x2cd   :  { %3875 = vmatprep.subr.bf16.mxu1 %v4253_v20 }
 0x2ce   :  { %3940 = vmatpush3.bf16.msra.mxu0 %v4269_v4 }
 0x2cf   :  { %3941 = vmatprep.subr.bf16.mxu0 %v4270_v11 }
 0x2d0   :  { %3876 = vmatpush3.bf16.msra.mxu1 %v4253_v20 }
 0x2d1   :  { %3877 = vmatprep.subr.bf16.mxu1 %v4254_v30 }
 0x2d2   :  { %3942 = vmatpush3.bf16.msra.mxu0 %v4270_v11 }
 0x2d3   :  { %3862 = vmatmul.mubr.bf16.gmra.mrb[72].mxu1 %v4987_v25  ;;  %3943 = vmatprep.subr.bf16.mxu0 %v4271_v16 }
 0x2d4   :  { %3878 = vmatpush3.bf16.msra.mxu1 %v4254_v30  ;;  %3865 = vmatprep.mubr.bf16.mxu1 %v1951_v2 }
 0x2d5   :  { %3879 = vmatprep.subr.bf16.mxu1 %v4255_v18 }
 0x2d6   :  { %3944 = vmatpush3.bf16.msra.mxu0 %v4271_v16 }
 0x2d7   :  { %3945 = vmatprep.subr.bf16.mxu0 %v4272_v37 }
 0x2d8   :  { %3880 = vmatpush3.bf16.msra.mxu1 %v4255_v18 }
 0x2d9   :  { %3881 = vmatprep.subr.bf16.mxu1 %v4256_v51 }
 0x2da   :  { %3946 = vmatpush3.bf16.msra.mxu0 %v4272_v37 }
 0x2db   :  { %3866 = vmatmul.mubr.bf16.gmra.mrb[76].mxu1 %v1952_v55  ;;  %3947 = vmatprep.subr.bf16.mxu0 %v4273_v29 }
 0x2dc   :  { %3882 = vmatpush3.bf16.msra.mxu1 %v4256_v51  ;;  %3885 = vmatprep.mubr.bf16.mxu1 %v4507_v0 }
 0x2dd   :  { %3883 = vmatprep.subr.bf16.mxu1 %v4257_v10 }
 0x2de   :  { %3948 = vmatpush3.bf16.msra.mxu0 %v4273_v29 }
 0x2df   :  { %3965 = vmatprep.subr.bf16.mxu0 %v5005_v14 }
 0x2e0   :  { %3884 = vmatpush3.bf16.msra.mxu1 %v4257_v10 }
 0x2e1   :  { %3901 = vmatprep.subr.bf16.mxu1 %v4258_v35 }
 0x2e3   :  { %3886 = vmatmul.mubr.bf16.vlgmr.msra.gmra.mrb[64].mxu1 %v4955_v31 }
 0x2e4   :  { %3902 = vmatpush3.bf16.msra.mxu1 %v4258_v35  ;;  %3889 = vmatprep.mubr.bf16.mxu1 %v4957_v13 }
 0x2e5   :  { %3903 = vmatprep.subr.bf16.mxu1 %v4259_v9 }
 0x2e8   :  { %3904 = vmatpush3.bf16.msra.mxu1 %v4259_v9 }
 0x2e9   :  { %3905 = vmatprep.subr.bf16.mxu1 %v4260_v15 }
 0x2eb   :  { %3890 = vmatmul.mubr.bf16.gmra.mrb[68].mxu1 %v4961_v21 }
 0x2ec   :  { %3906 = vmatpush3.bf16.msra.mxu1 %v4260_v15  ;;  %3893 = vmatprep.mubr.bf16.mxu1 %v4963_v42 }
 0x2ed   :  { %3907 = vmatprep.subr.bf16.mxu1 %v4261_v24 }
 0x2f0   :  { %3908 = vmatpush3.bf16.msra.mxu1 %v4261_v24 }
 0x2f1   :  { %3909 = vmatprep.subr.bf16.mxu1 %v4262_v43 }
 0x2f3   :  { %3894 = vmatmul.mubr.bf16.gmra.mrb[72].mxu1 %v4981_v48 }
 0x2f4   :  { %3910 = vmatpush3.bf16.msra.mxu1 %v4262_v43  ;;  %3897 = vmatprep.mubr.bf16.mxu1 %v4987_v25 }
 0x2f5   :  { %3911 = vmatprep.subr.bf16.mxu1 %v4263_v17 }
 0x2f8   :  { %3912 = vmatpush3.bf16.msra.mxu1 %v4263_v17 }
 0x2f9   :  { %3913 = vmatprep.subr.bf16.mxu1 %v4264_v19 }
 0x2fb   :  { %3898 = vmatmul.mubr.bf16.gmra.mrb[76].mxu1 %v1951_v2 }
 0x2fc   :  { %3914 = vmatpush3.bf16.msra.mxu1 %v4264_v19  ;;  %3917 = vmatprep.mubr.bf16.mxu1 %v4957_v13 }
 0x2fd   :  { %3915 = vmatprep.subr.bf16.mxu1 %v4265_v60 }
 0x300   :  { %3916 = vmatpush3.bf16.msra.mxu1 %v4265_v60 }
 0x303   :  { %3918 = vmatmul.mubr.bf16.vlgmr.msra.gmra.mrb[64].mxu1 %v4961_v21 }
 0x304   :  { %3921 = vmatprep.mubr.bf16.mxu1 %v4963_v42 }
 0x30b   :  { %3922 = vmatmul.mubr.bf16.gmra.mrb[68].mxu1 %v4981_v48 }
 0x30c   :  { %3925 = vmatprep.mubr.bf16.mxu1 %v4987_v25 }
 0x313   :  { %3926 = vmatmul.mubr.bf16.gmra.mrb[72].mxu1 %v1951_v2 }
 0x314   :  { %3929 = vmatprep.mubr.bf16.mxu1 %v1952_v55 }
 0x31b   :  { %3930 = vmatmul.mubr.bf16.gmra.mrb[76].mxu1 %v4507_v0 }
 0x3d6   :  { %v5008_v32 = vpop.f32.mrb[64].mxu1 }
 0x3d7   :  { %v5010_v22 = vpop.f32.mrb[65].mxu1  ;;  %v2498_v21 = vmul.f32 %v5008_v32, %v5008_v32 }
 0x3d8   :  { %v5012_v52 = vpop.f32.mrb[66].mxu1  ;;  %v2496_v13 = vmul.f32 %v5010_v22, %v5010_v22 }
 0x3d9   :  { %v5014_v31 = vpop.f32.mrb[67].mxu1  ;;  %v2499_v49 = vmul.f32 %v5012_v52, %v5012_v52 }
 0x3da   :  { %v2474_v39 = vadd.f32 %v5014_v31, %v5010_v22  ;;  %v2497_v54 = vmul.f32 %v5014_v31, %v5014_v31 }
 0x3dc   :  { %v2475_v38 = vadd.f32 %v5008_v32, %v2474_v39  ;;  %v2512_v42 = vadd.f32 %v2497_v54, %v2496_v13 }
 0x3de   :  { %v2513_v50 = vadd.f32 %v2512_v42, %v2498_v21  ;;  %v5027_v56 = vpop.f32.mrb[68].mxu1  ;;  %v2476_v58 = vadd.f32 %v5012_v52, %v2475_v38 }
 0x3df   :  { %v5030_v59 = vpop.f32.mrb[69].mxu1  ;;  %v2502_v40 = vmul.f32 %v5027_v56, %v5027_v56 }
 0x3e0   :  { %v2477_v27 = vadd.f32 %v2476_v58, %v5030_v59  ;;  %v2500_v62 = vmul.f32 %v5030_v59, %v5030_v59  ;;  %v2514_v34 = vadd.f32 %v2513_v50, %v2499_v49  ;;  %v5035_v53 = vpop.f32.mrb[70].mxu1 }
 0x3e1   :  { %v5037_v63 = vpop.f32.mrb[71].mxu1  ;;  %v2503_v5 = vmul.f32 %v5035_v53, %v5035_v53 }
 0x3e2   :  { %v2515_v1 = vadd.f32 %v2514_v34, %v2500_v62  ;;  %v2478_v3 = vadd.f32 %v2477_v27, %v5037_v63  ;;  %v2501_v61 = vmul.f32 %v5037_v63, %v5037_v63 }
 0x3e4   :  { %v2479_v57 = vadd.f32 %v5027_v56, %v2478_v3  ;;  %v2516_v12 = vadd.f32 %v2515_v1, %v2501_v61 }
 0x3e6   :  { %v2517_v41 = vadd.f32 %v2516_v12, %v2502_v40  ;;  %v5047_v45 = vpop.f32.mrb[72].mxu1  ;;  %v2480_v48 = vadd.f32 %v5035_v53, %v2479_v57 }
 0x3e7   :  { %v5050_v23 = vpop.f32.mrb[73].mxu1  ;;  %v2506_v44 = vmul.f32 %v5047_v45, %v5047_v45 }
 0x3e8   :  { %v2481_v36 = vadd.f32 %v2480_v48, %v5050_v23  ;;  %v2504_v47 = vmul.f32 %v5050_v23, %v5050_v23  ;;  %v2518_v25 = vadd.f32 %v2517_v41, %v2503_v5  ;;  %v5055_v26 = vpop.f32.mrb[74].mxu1  ;;  %v2472_v41 = vld [vmem:[%s5253_s6] sm:$0x1] }
 0x3e9   :  { %v5057_v6 = vpop.f32.mrb[75].mxu1  ;;  %v2507_v18 = vmul.f32 %v5055_v26, %v5055_v26 }
 0x3ea   :  { %v2519_v2 = vadd.f32 %v2518_v25, %v2504_v47  ;;  %v2482_v20 = vadd.f32 %v2481_v36, %v5057_v6  ;;  %v2505_v7 = vmul.f32 %v5057_v6, %v5057_v6  ;;  %v2473_v47 = vld [vmem:[%s5254_s7] sm:$0x1] }
 0x3ec   :  { %v2483_v55 = vadd.f32 %v5047_v45, %v2482_v20  ;;  %v2520_v30 = vadd.f32 %v2519_v2, %v2505_v7 }
 0x3ee   :  { %v2521_v51 = vadd.f32 %v2520_v30, %v2506_v44  ;;  %v5067_v10 = vpop.f32.mrb[76].mxu1  ;;  %v2484_v35 = vadd.f32 %v5055_v26, %v2483_v55 }
 0x3ef   :  { %v2441_v9 = vpop.f32.mrb[77].mxu1  ;;  %v2510_v8 = vmul.f32 %v5067_v10, %v5067_v10 }
 0x3f0   :  { %v2485_v15 = vadd.f32 %v2484_v35, %v2441_v9  ;;  %v2508_v24 = vmul.f32 %v2441_v9, %v2441_v9  ;;  %v2522_v43 = vadd.f32 %v2521_v51, %v2507_v18  ;;  %v5070_v17 = vpop.f32.mrb[78].mxu1 }
 0x3f1   :  { %v2444_v19 = vpop.f32.mrb[79].mxu1  ;;  %v2511_v16 = vmul.f32 %v5070_v17, %v5070_v17 }
 0x3f2   :  { %v2523_v60 = vadd.f32 %v2522_v43, %v2508_v24  ;;  %v2486_v28 = vadd.f32 %v2485_v15, %v2444_v19  ;;  %v2509_v46 = vmul.f32 %v2444_v19, %v2444_v19 }
 0x3f4   :  { %v2487_v4 = vadd.f32 %v5067_v10, %v2486_v28  ;;  %v2524_v11 = vadd.f32 %v2523_v60, %v2509_v46 }
 0x3f6   :  { %v2488_v37 = vadd.f32 %v5070_v17, %v2487_v4  ;;  %v2525_v29 = vadd.f32 %v2524_v11, %v2510_v8 }
 0x3f8   :  { %v2489_v13 = vrot.slane %v2488_v37, 4  ;;  %v2526_v39 = vadd.f32 %v2525_v29, %v2511_v16 }
 0x3fa   :  { %v2490_v54 = vadd.f32 %v2489_v13, %v2488_v37  ;;  %v2527_v21 = vrot.slane %v2526_v39, 4 }
 0x3fc   :  { %v2491_v38 = vrot.slane %v2490_v54, 2  ;;  %v2528_v42 = vadd.f32 %v2527_v21, %v2526_v39  ;;  %v4275_v21 = vld [vmem:[#allocation11 + $0x8] sm:$0xff]  }
 0x3fe   :  { %v2492_v49 = vadd.f32 %v2491_v38, %v2490_v54  ;;  %v2529_v50 = vrot.slane %v2528_v42, 2 }
 0x400   :  { %v2493_v58 = vrot.slane %v2492_v49, 1  ;;  %v2530_v27 = vadd.f32 %v2529_v50, %v2528_v42 }
 0x402   :  { %v2494_v62 = vadd.f32 %v2493_v58, %v2492_v49  ;;  %v2531_v34 = vrot.slane %v2530_v27, 1 }
 0x404   :  { %v2495_v1 = vmul.f32 0.0625, %v2494_v62  ;;  %v2532_v3 = vadd.f32 %v2531_v34, %v2530_v27 }
 0x406   :  { %v2533_v61 = vmul.f32 0.0625, %v2532_v3  ;;  %v2534_v40 = vmul.f32 %v2495_v1, %v2495_v1 }
 0x408   :  { %v2535_v57 = vsub.f32 %v2533_v61, %v2534_v40 }
 0x40a   :  { %v2536_v12 = vmax.f32 %v2535_v57, 0.0 }
 0x40c   :  { %v2537_v5 = vadd.f32 1e-05, %v2536_v12  ;;  %v4276_v12 = vld [vmem:[#allocation11 + $0x10] sm:$0xff]  }
 0x40e   :  { %4292 = vrsqrt.f32 %v2537_v5 }
 0x418   :  { %v4293_v48 = vpop.eup %4292 }
 0x419   :  { %v2539_v36 = vmul.f32 %v4293_v48, %v2472_v41 }
 0x41b   :  { %v2540_v25 = vmul.f32 %v2539_v36, %v2495_v1  ;;  %v2546_v2 = vrot.slane %v2539_v36, %v4891_v33 }
 0x41d   :  { %v2541_v20 = vsub.f32 %v2473_v47, %v2540_v25  ;;  %v2561_v7 = vmul.f32 %v2546_v2, %v2444_v19  ;;  %v2548_v44 = vmul.f32 %v2546_v2, %v5010_v22  ;;  %v2549_v55 = vmul.f32 %v2546_v2, %v5014_v31  ;;  %v4278_v25 = vld [vmem:[#allocation11 + $0x20] sm:$0xff]  }
 0x41e   :  { %v2550_v30 = vmul.f32 %v5008_v32, %v2546_v2  ;;  %v2551_v18 = vmul.f32 %v5012_v52, %v2546_v2  ;;  %v2552_v51 = vmul.f32 %v2546_v2, %v5030_v59  ;;  %v2553_v35 = vmul.f32 %v2546_v2, %v5037_v63 }
 0x41f   :  { %v2568_v15 = vrot.slane %v2541_v20, %v4891_v33  ;;  %v2554_v24 = vmul.f32 %v5027_v56, %v2546_v2  ;;  %v2555_v43 = vmul.f32 %v5035_v53, %v2546_v2  ;;  %v2556_v19 = vmul.f32 %v2546_v2, %v5050_v23  ;;  %v4280_v20 = vld [vmem:[#allocation11 + $0x30] sm:$0xff]  }
 0x420   :  { %v2557_v22 = vmul.f32 %v2546_v2, %v5057_v6  ;;  %v2558_v31 = vmul.f32 %v5047_v45, %v2546_v2  ;;  %v2559_v32 = vmul.f32 %v5055_v26, %v2546_v2  ;;  %v2560_v60 = vmul.f32 %v2546_v2, %v2441_v9 }
 0x421   :  { %v2583_v52 = vadd.f32 %v2568_v15, %v2561_v7  ;;  %v2570_v28 = vadd.f32 %v2568_v15, %v2548_v44  ;;  %v2571_v59 = vadd.f32 %v2568_v15, %v2549_v55  ;;  %v2572_v46 = vadd.f32 %v2568_v15, %v2550_v30  ;;  %v4281_v7 = vld [vmem:[#allocation11 + $0x38] sm:$0xff]   ;;  %v4282_v44 = vld [vmem:[#allocation11 + $0x80] sm:$0xff]   ;;  %v4283_v55 = vld [vmem:[#allocation11 + $0x88] sm:$0xff]  }
 0x422   :  { %v2573_v63 = vadd.f32 %v2568_v15, %v2551_v18  ;;  %v2574_v8 = vadd.f32 %v2568_v15, %v2552_v51  ;;  %v2575_v33 = vadd.f32 %v2568_v15, %v2553_v35  ;;  %v2576_v4 = vadd.f32 %v2568_v15, %v2554_v24  ;;  %v4284_v30 = vld [vmem:[#allocation11 + $0x90] sm:$0xff]   ;;  %v4285_v18 = vld [vmem:[#allocation11 + $0x98] sm:$0xff]   ;;  %v4286_v51 = vld [vmem:[#allocation11 + $0xa0] sm:$0xff]  }
 0x423   :  { %v2599_v56 = vmax.f32 %v2583_v52, 0.0  ;;  %v2586_v11 = vmax.f32 %v2570_v28, 0.0  ;;  %v2587_v53 = vmax.f32 %v2571_v59, 0.0  ;;  %v2588_v16 = vmax.f32 %v2572_v46, 0.0  ;;  %v4287_v35 = vld [vmem:[#allocation11 + $0xa8] sm:$0xff]   ;;  %v4289_v24 = vld [vmem:[#allocation11 + $0xb8] sm:$0xff]  }
 0x424   :  { %v2589_v23 = vmax.f32 %v2573_v63, 0.0  ;;  %v2590_v37 = vmax.f32 %v2574_v8, 0.0  ;;  %v2591_v6 = vmax.f32 %v2575_v33, 0.0  ;;  %v2577_v29 = vadd.f32 %v2568_v15, %v2555_v43  ;;  %v3548_v43 = vld [vmem:[%s5256_s9] ss:$0 sm:$0xff]  ;;  %s4509_s9 = smov [#allocation12]  }
 0x425   :  { %v2602_v45 = vpack.c.bf16 %v2587_v53, %v2586_v11  ;;  %v2592_v13 = vmax.f32 %v2576_v4, 0.0  ;;  %v2578_v26 = vadd.f32 %v2568_v15, %v2556_v19  ;;  %v2579_v9 = vadd.f32 %v2568_v15, %v2557_v22  ;;  %s3365_s22 = sshll.u32 %s4509_s9, 4  ;;  %s3366_s22 = int_to_ptr.vmem [resolvable:$true] %s3365_s22 }
 0x426   :  { %v5098_v39 = vpack.c.bf16 %v2589_v23, %v2588_v16  ;;  %v5100_v54 = vpack.c.bf16 %v2591_v6, %v2590_v37  ;;  %v2593_v38 = vmax.f32 %v2577_v29, 0.0  ;;  %v2580_v42 = vadd.f32 %v2568_v15, %v2558_v31  ;;  %s4468_s25 = scalar_lea.vmem %s3366_s22, 2048  ;;  %p4473_p13 = scmp.lt.s32.totalorder %s3366_s22, %s3366_s22 }
 0x427   :  { %3949 = vmatprep.mubr.bf16.mxu0 %v2602_v45  ;;  %v2594_v49 = vmax.f32 %v2578_v26, 0.0  ;;  %v2595_v50 = vmax.f32 %v2579_v9, 0.0  ;;  %v2581_v58 = vadd.f32 %v2568_v15, %v2559_v32  ;;  %v2582_v27 = vadd.f32 %v2568_v15, %v2560_v60  ;;  %p4469_p12 = scmp.ne.s32.totalorder %s3366_s22, %s4468_s25  ;;  %p4474_p0 = scmp.lt.s32.totalorder %s4468_s25, %s4468_s25 }
 0x428   :  { %3950 = vmatmul.mubr.bf16.vlgmr.msra.gmra.mrb[64].mxu0 %v5098_v39  ;;  %v5103_v62 = vpack.c.bf16 %v2593_v38, %v2592_v13  ;;  %v2596_v34 = vmax.f32 %v2580_v42, 0.0  ;;  %v2562_v1 = vmul.f32 %v5067_v10, %v2546_v2  ;;  %v2563_v3 = vmul.f32 %v5070_v17, %v2546_v2  ;;  %v4277_v17 = vld [vmem:[#allocation11 + $0x18] sm:$0xff]   ;;  %v4279_v2 = vld [vmem:[#allocation11 + $0x28] sm:$0xff]  }
 0x429   :  { %3966 = vmatpush3.bf16.msra.mxu0 %v5005_v14  ;;  %3953 = vmatprep.mubr.bf16.mxu0 %v5100_v54  ;;  %v5109_v61 = vpack.c.bf16 %v2595_v50, %v2594_v49  ;;  %v2597_v40 = vmax.f32 %v2581_v58, 0.0  ;;  %v2598_v57 = vmax.f32 %v2582_v27, 0.0  ;;  %p4475_p1 = por %p4474_p0, %p4473_p13 }
 0x42a   :  { %3967 = vmatprep.subr.bf16.mxu0 %v4275_v21  ;;  %v2584_v5 = vadd.f32 %v2568_v15, %v2562_v1  ;;  %v2585_v41 = vadd.f32 %v2568_v15, %v2563_v3  ;;  %v4288_v15 = vld [vmem:[#allocation11 + $0xb0] sm:$0xff]  }
 0x42b   :  { %v5111_v48 = vpack.c.bf16 %v2597_v40, %v2596_v34  ;;  %v5113_v36 = vpack.c.bf16 %v2599_v56, %v2598_v57  ;;  %p4476_p2 = pnand %p4475_p1, %p4469_p12 }
 0x42c   :  { %v2600_v47 = vmax.f32 %v2584_v5, 0.0  ;;  %v2601_v10 = vmax.f32 %v2585_v41, 0.0 }
 0x42d   :  { %3968 = vmatpush3.bf16.msra.mxu0 %v4275_v21 }
 0x42e   :  { %3969 = vmatprep.subr.bf16.mxu0 %v4276_v12  ;;  %v2609_v14 = vpack.c.bf16 %v2601_v10, %v2600_v47 }
 0x430   :  { %3954 = vmatmul.mubr.bf16.gmra.mrb[68].mxu0 %v5103_v62 }
 0x431   :  { %3970 = vmatpush3.bf16.msra.mxu0 %v4276_v12  ;;  %3957 = vmatprep.mubr.bf16.mxu0 %v5109_v61 }
 0x432   :  { %3971 = vmatprep.subr.bf16.mxu0 %v4277_v17 }
 0x435   :  { %3972 = vmatpush3.bf16.msra.mxu0 %v4277_v17 }
 0x436   :  { %3973 = vmatprep.subr.bf16.mxu0 %v4278_v25 }
 0x438   :  { %3958 = vmatmul.mubr.bf16.gmra.mrb[72].mxu0 %v5111_v48 }
 0x439   :  { %3974 = vmatpush3.bf16.msra.mxu0 %v4278_v25  ;;  %3961 = vmatprep.mubr.bf16.mxu0 %v5113_v36 }
 0x43a   :  { %3975 = vmatprep.subr.bf16.mxu0 %v4279_v2 }
 0x43d   :  { %3976 = vmatpush3.bf16.msra.mxu0 %v4279_v2 }
 0x43e   :  { %3977 = vmatprep.subr.bf16.mxu0 %v4280_v20 }
 0x440   :  { %3962 = vmatmul.mubr.bf16.gmra.mrb[76].mxu0 %v2609_v14 }
 0x441   :  { %3978 = vmatpush3.bf16.msra.mxu0 %v4280_v20  ;;  %3981 = vmatprep.mubr.bf16.mxu0 %v4507_v0 }
 0x442   :  { %3979 = vmatprep.subr.bf16.mxu0 %v4281_v7 }
 0x445   :  { %3980 = vmatpush3.bf16.msra.mxu0 %v4281_v7 }
 0x446   :  { %3997 = vmatprep.subr.bf16.mxu0 %v4282_v44 }
 0x448   :  { %3982 = vmatmul.mubr.bf16.vlgmr.msra.gmra.mrb[64].mxu0 %v2602_v45 }
 0x449   :  { %3998 = vmatpush3.bf16.msra.mxu0 %v4282_v44  ;;  %3985 = vmatprep.mubr.bf16.mxu0 %v5098_v39 }
 0x44a   :  { %3999 = vmatprep.subr.bf16.mxu0 %v4283_v55 }
 0x44d   :  { %4000 = vmatpush3.bf16.msra.mxu0 %v4283_v55 }
 0x44e   :  { %4001 = vmatprep.subr.bf16.mxu0 %v4284_v30 }
 0x450   :  { %3986 = vmatmul.mubr.bf16.gmra.mrb[68].mxu0 %v5100_v54 }
 0x451   :  { %4002 = vmatpush3.bf16.msra.mxu0 %v4284_v30  ;;  %3989 = vmatprep.mubr.bf16.mxu0 %v5103_v62 }
 0x452   :  { %4003 = vmatprep.subr.bf16.mxu0 %v4285_v18 }
 0x455   :  { %4004 = vmatpush3.bf16.msra.mxu0 %v4285_v18 }
 0x456   :  { %4005 = vmatprep.subr.bf16.mxu0 %v4286_v51 }
 0x458   :  { %3990 = vmatmul.mubr.bf16.gmra.mrb[72].mxu0 %v5109_v61 }
 0x459   :  { %4006 = vmatpush3.bf16.msra.mxu0 %v4286_v51  ;;  %3993 = vmatprep.mubr.bf16.mxu0 %v5111_v48 }
 0x45a   :  { %4007 = vmatprep.subr.bf16.mxu0 %v4287_v35 }
 0x45d   :  { %4008 = vmatpush3.bf16.msra.mxu0 %v4287_v35 }
 0x45e   :  { %4009 = vmatprep.subr.bf16.mxu0 %v4288_v15 }
 0x460   :  { %3994 = vmatmul.mubr.bf16.gmra.mrb[76].mxu0 %v5113_v36 }
 0x461   :  { %4010 = vmatpush3.bf16.msra.mxu0 %v4288_v15  ;;  %4013 = vmatprep.mubr.bf16.mxu0 %v5098_v39 }
 0x462   :  { %4011 = vmatprep.subr.bf16.mxu0 %v4289_v24 }
 0x465   :  { %4012 = vmatpush3.bf16.msra.mxu0 %v4289_v24 }
 0x468   :  { %4014 = vmatmul.mubr.bf16.vlgmr.msra.gmra.mrb[64].mxu0 %v5100_v54 }
 0x469   :  { %4017 = vmatprep.mubr.bf16.mxu0 %v5103_v62 }
 0x470   :  { %4018 = vmatmul.mubr.bf16.gmra.mrb[68].mxu0 %v5109_v61 }
 0x471   :  { %4021 = vmatprep.mubr.bf16.mxu0 %v5111_v48 }
 0x478   :  { %4022 = vmatmul.mubr.bf16.gmra.mrb[72].mxu0 %v5113_v36 }
 0x479   :  { %4025 = vmatprep.mubr.bf16.mxu0 %v2609_v14 }
 0x480   :  { %4026 = vmatmul.mubr.bf16.gmra.mrb[76].mxu0 %v4507_v0 }
 0x53b   :  { %v4015_v19 = vpop.f32.mrb[64].mxu0 }
 0x53c   :  { %v3138_v22 = vadd.f32 %v4015_v19, %v3548_v43  ;;  %v3050_v31 = vpop.f32.mrb[65].mxu0 }
 0x53d   :  { %v3136_v32 = vadd.f32 %v3548_v43, %v3050_v31  ;;  %v4016_v60 = vpop.f32.mrb[66].mxu0 }
 0x53e   :  { %3156 = vmax.xlane.f32.xlu1 %v3138_v22  ;;  %v3053_v52 = vpop.f32.mrb[67].mxu0  ;;  %v3139_v28 = vadd.f32 %v4016_v60, %v3548_v43 }
 0x53f   :  { %3152 = vmax.xlane.f32.xlu0 %v3136_v32  ;;  %v3137_v59 = vadd.f32 %v3548_v43, %v3053_v52 }
 0x542   :  { %3158 = vmax.xlane.f32.xlu1 %v3139_v28 }
 0x543   :  { %3154 = vmax.xlane.f32.xlu0 %v3137_v59  ;;  %v4019_v46 = vpop.f32.mrb[68].mxu0 }
 0x544   :  { %v3142_v63 = vadd.f32 %v4019_v46, %v3548_v43  ;;  %v3066_v8 = vpop.f32.mrb[69].mxu0 }
 0x545   :  { %v4020_v0 = vpop.f32.mrb[70].mxu0  ;;  %v3140_v56 = vadd.f32 %v3548_v43, %v3066_v8 }
 0x546   :  { %v3143_v33 = vadd.f32 %v4020_v0, %v3548_v43  ;;  %v3069_v4 = vpop.f32.mrb[71].mxu0 }
 0x547   :  { %3164 = vmax.xlane.f32.xlu0 %v3142_v63  ;;  %v3141_v11 = vadd.f32 %v3548_v43, %v3069_v4 }
 0x548   :  { %3166 = vmax.xlane.f32.xlu1 %v3143_v33 }
 0x54b   :  { %3160 = vmax.xlane.f32.xlu0 %v3140_v56  ;;  %v4023_v53 = vpop.f32.mrb[72].mxu0 }
 0x54c   :  { %v5136_v16 = vadd.f32 %v4023_v53, %v3548_v43  ;;  %3162 = vmax.xlane.f32.xlu1 %v3141_v11  ;;  %v3082_v23 = vpop.f32.mrb[73].mxu0 }
 0x54d   :  { %v4024_v37 = vpop.f32.mrb[74].mxu0  ;;  %v5142_v45 = vadd.f32 %v3548_v43, %v3082_v23 }
 0x54e   :  { %v5138_v6 = vadd.f32 %v4024_v37, %v3548_v43  ;;  %v3085_v29 = vpop.f32.mrb[75].mxu0 }
 0x54f   :  { %3172 = vmax.xlane.f32.xlu0 %v5136_v16  ;;  %v5144_v13 = vadd.f32 %v3548_v43, %v3085_v29 }
 0x550   :  { %3174 = vmax.xlane.f32.xlu1 %v5138_v6 }
 0x553   :  { %3168 = vmax.xlane.f32.xlu0 %v5142_v45  ;;  %v4027_v26 = vpop.f32.mrb[76].mxu0 }
 0x554   :  { %3170 = vmax.xlane.f32.xlu1 %v5144_v13  ;;  %v3098_v9 = vpop.f32.mrb[77].mxu0  ;;  %v5153_v42 = vadd.f32 %v4027_v26, %v3548_v43 }
 0x555   :  { %v5148_v39 = vadd.f32 %v3548_v43, %v3098_v9  ;;  %v4028_v54 = vpop.f32.mrb[78].mxu0 }
 0x556   :  { %v3101_v21 = vpop.f32.mrb[79].mxu0  ;;  %v5156_v49 = vadd.f32 %v4028_v54, %v3548_v43 }
 0x557   :  { %v5150_v38 = vadd.f32 %v3548_v43, %v3101_v21  ;;  %3176 = vmax.xlane.f32.xlu0 %v5148_v39 }
 0x559   :  { %3178 = vmax.xlane.f32.xlu1 %v5150_v38 }
 0x55b   :  { %3180 = vmax.xlane.f32.xlu0 %v5153_v42 }
 0x55d   :  { %3182 = vmax.xlane.f32.xlu1 %v5156_v49 }
 0x5cb   :  { %v3157_v50 = vpop.xlane.xlu1 %3156 }
 0x5cc   :  { %v3186_v58 = vsub.f32 %v3138_v22, %v3157_v50  ;;  %v3153_v27 = vpop.xlane.xlu0 %3152 }
 0x5cd   :  { %v3184_v62 = vsub.f32 %v3136_v32, %v3153_v27 }
 0x5ce   :  { %v3204_v34 = vmul.f32 1.442695, %v3186_v58 }
 0x5cf   :  { %v3200_v1 = vmul.f32 1.442695, %v3184_v62  ;;  %v3159_v3 = vpop.xlane.xlu1 %3158 }
 0x5d0   :  { %4294 = vpow2.f32 %v3204_v34  ;;  %v3187_v61 = vsub.f32 %v3139_v28, %v3159_v3  ;;  %v3155_v40 = vpop.xlane.xlu0 %3154 }
 0x5d1   :  { %v3185_v57 = vsub.f32 %v3137_v59, %v3155_v40  ;;  %4296 = vpow2.f32 %v3200_v1 }
 0x5d2   :  { %v3206_v12 = vmul.f32 1.442695, %v3187_v61 }
 0x5d3   :  { %v3202_v5 = vmul.f32 1.442695, %v3185_v57 }
 0x5d4   :  { %4298 = vpow2.f32 %v3206_v12  ;;  %v3165_v41 = vpop.xlane.xlu0 %3164 }
 0x5d5   :  { %v3190_v48 = vsub.f32 %v3142_v63, %v3165_v41  ;;  %v3167_v36 = vpop.xlane.xlu1 %3166  ;;  %4300 = vpow2.f32 %v3202_v5 }
 0x5d6   :  { %v3191_v47 = vsub.f32 %v3143_v33, %v3167_v36 }
 0x5d7   :  { %v3212_v10 = vmul.f32 1.442695, %v3190_v48 }
 0x5d8   :  { %v3214_v17 = vmul.f32 1.442695, %v3191_v47  ;;  %v3161_v14 = vpop.xlane.xlu0 %3160 }
 0x5d9   :  { %4302 = vpow2.f32 %v3212_v10  ;;  %v3188_v25 = vsub.f32 %v3140_v56, %v3161_v14  ;;  %v3163_v2 = vpop.xlane.xlu1 %3162 }
 0x5da   :  { %v5160_v20 = vpop.eup %4294  ;;  %v3189_v7 = vsub.f32 %v3141_v11, %v3163_v2  ;;  %4304 = vpow2.f32 %v3214_v17 }
 0x5db   :  { %v3208_v44 = vmul.f32 1.442695, %v3188_v25  ;;  %3236 = vadd.xlane.f32.xlu0 %v5160_v20  ;;  %v5163_v18 = vpop.eup %4296 }
 0x5dc   :  { %v3210_v55 = vmul.f32 1.442695, %v3189_v7  ;;  %v3173_v30 = vpop.xlane.xlu0 %3172 }
 0x5dd   :  { %4306 = vpow2.f32 %v3208_v44  ;;  %v3194_v51 = vsub.f32 %v5136_v16, %v3173_v30  ;;  %v3175_v35 = vpop.xlane.xlu1 %3174 }
 0x5de   :  { %v5166_v15 = vpop.eup %4298  ;;  %v3195_v24 = vsub.f32 %v5138_v6, %v3175_v35  ;;  %4308 = vpow2.f32 %v3210_v55 }
 0x5df   :  { %v3220_v43 = vmul.f32 1.442695, %v3194_v51  ;;  %3232 = vadd.xlane.f32.xlu0 %v5163_v18  ;;  %3238 = vadd.xlane.f32.xlu1 %v5166_v15  ;;  %v5172_v60 = vpop.eup %4300 }
 0x5e0   :  { %v3222_v19 = vmul.f32 1.442695, %v3195_v24  ;;  %v3169_v22 = vpop.xlane.xlu0 %3168 }
 0x5e1   :  { %4310 = vpow2.f32 %v3220_v43  ;;  %v3192_v31 = vsub.f32 %v5142_v45, %v3169_v22  ;;  %v3171_v32 = vpop.xlane.xlu1 %3170 }
 0x5e2   :  { %v3193_v52 = vsub.f32 %v5144_v13, %v3171_v32  ;;  %4312 = vpow2.f32 %v3222_v19 }
 0x5e3   :  { %v5175_v28 = vpop.eup %4302  ;;  %v3216_v59 = vmul.f32 1.442695, %v3192_v31  ;;  %3234 = vadd.xlane.f32.xlu1 %v5172_v60 }
 0x5e4   :  { %v3218_v46 = vmul.f32 1.442695, %v3193_v52  ;;  %3244 = vadd.xlane.f32.xlu0 %v5175_v28  ;;  %v3177_v63 = vpop.xlane.xlu0 %3176  ;;  %v5180_v0 = vpop.eup %4304 }
 0x5e5   :  { %4314 = vpow2.f32 %v3216_v59  ;;  %v3196_v8 = vsub.f32 %v5148_v39, %v3177_v63 }
 0x5e6   :  { %v3179_v33 = vpop.xlane.xlu1 %3178  ;;  %4316 = vpow2.f32 %v3218_v46 }
 0x5e7   :  { %v5182_v4 = vpop.eup %4306  ;;  %v3224_v56 = vmul.f32 1.442695, %v3196_v8  ;;  %v3197_v11 = vsub.f32 %v5150_v38, %v3179_v33  ;;  %3246 = vadd.xlane.f32.xlu1 %v5180_v0 }
 0x5e8   :  { %3240 = vadd.xlane.f32.xlu0 %v5182_v4  ;;  %v3181_v53 = vpop.xlane.xlu0 %3180  ;;  %v5188_v37 = vpop.eup %4308 }
 0x5e9   :  { %4318 = vpow2.f32 %v3224_v56  ;;  %v3226_v16 = vmul.f32 1.442695, %v3197_v11  ;;  %v3198_v23 = vsub.f32 %v5153_v42, %v3181_v53 }
 0x5ea   :  { %v3183_v6 = vpop.xlane.xlu1 %3182 }
 0x5eb   :  { %v5190_v29 = vpop.eup %4310  ;;  %4320 = vpow2.f32 %v3226_v16  ;;  %v3228_v45 = vmul.f32 1.442695, %v3198_v23  ;;  %v3199_v13 = vsub.f32 %v5156_v49, %v3183_v6  ;;  %3242 = vadd.xlane.f32.xlu1 %v5188_v37 }
 0x5ec   :  { %3252 = vadd.xlane.f32.xlu0 %v5190_v29  ;;  %v5195_v9 = vpop.eup %4312 }
 0x5ed   :  { %4322 = vpow2.f32 %v3228_v45  ;;  %v3230_v26 = vmul.f32 1.442695, %v3199_v13 }
 0x5ef   :  { %v5197_v39 = vpop.eup %4314  ;;  %4324 = vpow2.f32 %v3230_v26  ;;  %3254 = vadd.xlane.f32.xlu1 %v5195_v9 }
 0x5f0   :  { %3248 = vadd.xlane.f32.xlu0 %v5197_v39  ;;  %v5201_v54 = vpop.eup %4316 }
 0x5f3   :  { %v5203_v21 = vpop.eup %4318  ;;  %3250 = vadd.xlane.f32.xlu1 %v5201_v54 }
 0x5f4   :  { %3256 = vadd.xlane.f32.xlu0 %v5203_v21 }
 0x5f5   :  { %v5207_v38 = vpop.eup %4320 }
 0x5f7   :  { %v5209_v42 = vpop.eup %4322  ;;  %3258 = vadd.xlane.f32.xlu1 %v5207_v38 }
 0x5f8   :  { %3260 = vadd.xlane.f32.xlu0 %v5209_v42 }
 0x5f9   :  { %v5213_v49 = vpop.eup %4324 }
 0x5fb   :  { %3262 = vadd.xlane.f32.xlu1 %v5213_v49 }
 0x668   :  { %v3237_v50 = vpop.xlane.xlu0 %3236 }
 0x669   :  { %4326 = vrcp.f32 %v3237_v50 }
 0x66c   :  { %v3233_v58 = vpop.xlane.xlu0 %3232  ;;  %v3239_v27 = vpop.xlane.xlu1 %3238 }
 0x66d   :  { %4328 = vrcp.f32 %v3233_v58 }
 0x66e   :  { %4330 = vrcp.f32 %v3239_v27 }
 0x670   :  { %v3235_v62 = vpop.xlane.xlu1 %3234 }
 0x671   :  { %4332 = vrcp.f32 %v3235_v62  ;;  %v3245_v34 = vpop.xlane.xlu0 %3244 }
 0x672   :  { %4334 = vrcp.f32 %v3245_v34 }
 0x673   :  { %v4327_v1 = vpop.eup %4326 }
 0x674   :  { %v3282_v3 = vmul.f32 %v4327_v1, %v3237_v50  ;;  %v3247_v61 = vpop.xlane.xlu1 %3246 }
 0x675   :  { %4336 = vrcp.f32 %v3247_v61  ;;  %v3241_v40 = vpop.xlane.xlu0 %3240 }
 0x676   :  { %v3298_v57 = vsub.f32 2.0, %v3282_v3  ;;  %4338 = vrcp.f32 %v3241_v40 }
 0x677   :  { %v4329_v12 = vpop.eup %4328 }
 0x678   :  { %v4331_v5 = vpop.eup %4330  ;;  %v3314_v41 = vmul.f32 %v4327_v1, %v3298_v57  ;;  %v3280_v48 = vmul.f32 %v4329_v12, %v3233_v58  ;;  %v3243_v36 = vpop.xlane.xlu1 %3242 }
 0x679   :  { %v3283_v47 = vmul.f32 %v4331_v5, %v3239_v27  ;;  %4340 = vrcp.f32 %v3243_v36  ;;  %v3253_v10 = vpop.xlane.xlu0 %3252 }
 0x67a   :  { %v3330_v17 = vmul.f32 %v5160_v20, %v3314_v41  ;;  %v3296_v14 = vsub.f32 2.0, %v3280_v48  ;;  %4342 = vrcp.f32 %v3253_v10 }
 0x67b   :  { %v4333_v25 = vpop.eup %4332  ;;  %v3299_v2 = vsub.f32 2.0, %v3283_v47 }
 0x67c   :  { %v4335_v7 = vpop.eup %4334  ;;  %3346 = vst [vmem:[#allocation12 + $0x10] sm:$0xff] %v3330_v17  ;;  %v3312_v44 = vmul.f32 %v4329_v12, %v3296_v14  ;;  %v3281_v55 = vmul.f32 %v4333_v25, %v3235_v62  ;;  %v3255_v30 = vpop.xlane.xlu1 %3254 }
 0x67d   :  { %v3315_v51 = vmul.f32 %v4331_v5, %v3299_v2  ;;  %v3286_v35 = vmul.f32 %v4335_v7, %v3245_v34  ;;  %4344 = vrcp.f32 %v3255_v30  ;;  %v3249_v24 = vpop.xlane.xlu0 %3248 }
 0x67e   :  { %v3328_v43 = vmul.f32 %v5163_v18, %v3312_v44  ;;  %v3297_v19 = vsub.f32 2.0, %v3281_v55  ;;  %4346 = vrcp.f32 %v3249_v24 }
 0x67f   :  { %v4337_v22 = vpop.eup %4336  ;;  %v3331_v20 = vmul.f32 %v5166_v15, %v3315_v51  ;;  %v3302_v31 = vsub.f32 2.0, %v3286_v35 }
 0x680   :  { %v4339_v32 = vpop.eup %4338  ;;  %3344 = vst [vmem:[#allocation12] sm:$0xff] %v3328_v43  ;;  %v3313_v52 = vmul.f32 %v4333_v25, %v3297_v19  ;;  %v3287_v59 = vmul.f32 %v4337_v22, %v3247_v61  ;;  %v3251_v46 = vpop.xlane.xlu1 %3250 }
 0x681   :  { %3347 = vst [vmem:[#allocation12 + $0x18] sm:$0xff] %v3331_v20  ;;  %v3318_v63 = vmul.f32 %v4335_v7, %v3302_v31  ;;  %v3284_v8 = vmul.f32 %v4339_v32, %v3241_v40  ;;  %4348 = vrcp.f32 %v3251_v46  ;;  %v3257_v33 = vpop.xlane.xlu0 %3256 }
 0x682   :  { %v3329_v56 = vmul.f32 %v5172_v60, %v3313_v52  ;;  %v3303_v11 = vsub.f32 2.0, %v3287_v59  ;;  %4350 = vrcp.f32 %v3257_v33 }
 0x683   :  { %v4341_v18 = vpop.eup %4340  ;;  %v3334_v53 = vmul.f32 %v5175_v28, %v3318_v63  ;;  %v3300_v16 = vsub.f32 2.0, %v3284_v8 }
 0x684   :  { %v4343_v15 = vpop.eup %4342  ;;  %3345 = vst [vmem:[#allocation12 + $0x8] sm:$0xff] %v3329_v56  ;;  %v3319_v23 = vmul.f32 %v4337_v22, %v3303_v11  ;;  %v3285_v6 = vmul.f32 %v4341_v18, %v3243_v36  ;;  %v3259_v45 = vpop.xlane.xlu1 %3258 }
 0x685   :  { %3350 = vst [vmem:[#allocation12 + $0x30] sm:$0xff] %v3334_v53  ;;  %v3316_v13 = vmul.f32 %v4339_v32, %v3300_v16  ;;  %v3290_v26 = vmul.f32 %v4343_v15, %v3253_v10  ;;  %4352 = vrcp.f32 %v3259_v45  ;;  %v3261_v50 = vpop.xlane.xlu0 %3260 }
 0x686   :  { %v3335_v58 = vmul.f32 %v5180_v0, %v3319_v23  ;;  %v3301_v27 = vsub.f32 2.0, %v3285_v6  ;;  %4354 = vrcp.f32 %v3261_v50 }
 0x687   :  { %v4345_v60 = vpop.eup %4344  ;;  %v3332_v62 = vmul.f32 %v5182_v4, %v3316_v13  ;;  %v3306_v34 = vsub.f32 2.0, %v3290_v26 }
 0x688   :  { %v4347_v28 = vpop.eup %4346  ;;  %3351 = vst [vmem:[#allocation12 + $0x38] sm:$0xff] %v3335_v58  ;;  %v3317_v1 = vmul.f32 %v4341_v18, %v3301_v27  ;;  %v3291_v3 = vmul.f32 %v4345_v60, %v3255_v30  ;;  %v3263_v61 = vpop.xlane.xlu1 %3262 }
 0x689   :  { %3348 = vst [vmem:[#allocation12 + $0x20] sm:$0xff] %v3332_v62  ;;  %v3322_v40 = vmul.f32 %v4343_v15, %v3306_v34  ;;  %v3288_v57 = vmul.f32 %v4347_v28, %v3249_v24  ;;  %4356 = vrcp.f32 %v3263_v61 }
 0x68a   :  { %v3333_v12 = vmul.f32 %v5188_v37, %v3317_v1  ;;  %v3307_v5 = vsub.f32 2.0, %v3291_v3 }
 0x68b   :  { %v4349_v41 = vpop.eup %4348  ;;  %v3338_v0 = vmul.f32 %v5190_v29, %v3322_v40  ;;  %v3304_v48 = vsub.f32 2.0, %v3288_v57 }
 0x68c   :  { %v4351_v36 = vpop.eup %4350  ;;  %3349 = vst [vmem:[#allocation12 + $0x28] sm:$0xff] %v3333_v12  ;;  %v3323_v4 = vmul.f32 %v4345_v60, %v3307_v5  ;;  %v3289_v47 = vmul.f32 %v4349_v41, %v3251_v46 }
 0x68d   :  { %3354 = vst [vmem:[#allocation12 + $0x50] sm:$0xff] %v3338_v0  ;;  %v3320_v10 = vmul.f32 %v4347_v28, %v3304_v48  ;;  %v3292_v17 = vmul.f32 %v4351_v36, %v3257_v33 }
 0x68e   :  { %v3339_v14 = vmul.f32 %v5195_v9, %v3323_v4  ;;  %v3305_v25 = vsub.f32 2.0, %v3289_v47 }
 0x68f   :  { %v4353_v2 = vpop.eup %4352  ;;  %v3336_v7 = vmul.f32 %v5197_v39, %v3320_v10  ;;  %v3308_v44 = vsub.f32 2.0, %v3292_v17 }
 0x690   :  { %v4355_v37 = vpop.eup %4354  ;;  %3355 = vst [vmem:[#allocation12 + $0x58] sm:$0xff] %v3339_v14  ;;  %v3321_v55 = vmul.f32 %v4349_v41, %v3305_v25  ;;  %v3293_v30 = vmul.f32 %v4353_v2, %v3259_v45 }
 0x691   :  { %3352 = vst [vmem:[#allocation12 + $0x40] sm:$0xff] %v3336_v7  ;;  %v3324_v29 = vmul.f32 %v4351_v36, %v3308_v44  ;;  %v3294_v51 = vmul.f32 %v4355_v37, %v3261_v50 }
 0x692   :  { %v3337_v35 = vmul.f32 %v5201_v54, %v3321_v55  ;;  %v3309_v24 = vsub.f32 2.0, %v3293_v30 }
 0x693   :  { %v4357_v43 = vpop.eup %4356  ;;  %v3340_v19 = vmul.f32 %v5203_v21, %v3324_v29  ;;  %v3310_v22 = vsub.f32 2.0, %v3294_v51 }
 0x694   :  { %3353 = vst [vmem:[#allocation12 + $0x48] sm:$0xff] %v3337_v35  ;;  %v3325_v9 = vmul.f32 %v4353_v2, %v3309_v24  ;;  %v3295_v20 = vmul.f32 %v4357_v43, %v3263_v61 }
 0x695   :  { %3356 = vst [vmem:[#allocation12 + $0x60] sm:$0xff] %v3340_v19  ;;  %v3326_v39 = vmul.f32 %v4355_v37, %v3310_v22 }
 0x696   :  { %v3341_v31 = vmul.f32 %v5207_v38, %v3325_v9  ;;  %v3311_v32 = vsub.f32 2.0, %v3295_v20 }
 0x697   :  { %v3342_v52 = vmul.f32 %v5209_v42, %v3326_v39 }
 0x698   :  { %3357 = vst [vmem:[#allocation12 + $0x68] sm:$0xff] %v3341_v31  ;;  %v3327_v59 = vmul.f32 %v4357_v43, %v3311_v32 }
 0x699   :  { %3358 = vst [vmem:[#allocation12 + $0x70] sm:$0xff] %v3342_v52 }
 0x69a   :  { %v3343_v54 = vmul.f32 %v5213_v49, %v3327_v59 }
 0x69c   :  { %3359 = vst [vmem:[#allocation12 + $0x78] sm:$0xff] %v3343_v54 }
 0x69d   :  { %4479 = shalt.err (!%p4476_p2)
}
 0x69e   :  { %s4480_s0 = scalar_lea.hbm %s5257_s10, 2048 }
 0x69f   :  { %p4481_p3 = scmp.ne.s32.totalorder %s5257_s10, %s4480_s0  ;;  %p4484_p4 = scmp.lt.u32.totalorder %s4480_s0, %s5257_s10 }
 0x6a1   :  { %p4486_p5 = pnand %p4484_p4, %p4481_p3 }
 0x6a3   :  { %4489 = shalt.err (!%p4486_p5)
}
 0x6a4   :  { %3371 = dma.vmem_to_hbm [thread:$0]  %s3366_s22, 2048, %s5257_s10, [#allocation5], %s4499_s23, %s4499_s23, %s4500_s24  }
 0x6a5   :  { %4496 = dma.done.wait [#allocation5], 2048  }
 0x6a6   :  { %4497 = vsyncadd [#allocation5], 4294965248 }
 0x6a7   :  { %3375 = vsyncpa [#allocation4], 1 }
 0x6a8   :  { %3376 = vsyncpa [#allocation7], 1 }
 0x6a9   :  { %3377 = vsyncpa [#allocation10], 1 }
 0x6aa   :  { %3378 = vsyncpa [#allocation5], 1 }

</bundles_post_ra>
